<compile_context>
chip_gen: v7x
topology: tpu7x:2x2x1
jax: 0.10.0
libtpu: 0.0.40
codegen_flags: <defaults>
</compile_context>

<pallas_src>
import numpy as np
import jax
import jax.numpy as jnp
from jax import lax
from jax.experimental import pallas as pl
from jax.experimental.pallas import tpu as pltpu


def lstm_kernel(x_ref, wih0_ref, whh0_ref, b0_ref, wih1_ref, whh1_ref, b1_ref,
                hs_ref, xg_s, h0_s, c0_s, h1_s, c1_s):
    """One T-chunk of the 2-layer LSTM recurrence.

    x_ref   : (Tt, Bs, D)   streamed input chunk
    wih0_ref: (D, 4H)       layer-0 input weight (transposed, compute dtype)
    whh0_ref: (H, 4H)       layer-0 recurrent weight
    b0_ref  : (1, 4H)       b_ih0 + b_hh0 (f32)
    wih1_ref: (H, 4H)       layer-1 input weight
    whh1_ref: (H, 4H)       layer-1 recurrent weight
    b1_ref  : (1, 4H)       b_ih1 + b_hh1 (f32)
    hs_ref  : (Tt, Bs, H)   output chunk: layer-1 hidden states
    xg_s    : (Tt, Bs, 4H)  f32 scratch: per-chunk hoisted x @ Wih0 + b0
    h0_s/c0_s/h1_s/c1_s : (Bs, H) f32 scratch carrying state across chunks
    """
    Tt, Bs, D = x_ref.shape
    H = hs_ref.shape[2]
    G = 4 * H
    cdt = wih0_ref.dtype  # matmul operand dtype (f32 or bf16)

    # Re-initialize the recurrent state at the start of each batch shard's time sweep.
    @pl.when(pl.program_id(1) == 0)
    def _():
        h0_s[...] = jnp.zeros_like(h0_s)
        c0_s[...] = jnp.zeros_like(c0_s)
        h1_s[...] = jnp.zeros_like(h1_s)
        c1_s[...] = jnp.zeros_like(c1_s)

    whh0 = whh0_ref[...]
    wih1 = wih1_ref[...]
    whh1 = whh1_ref[...]

    # Per-chunk layer-0 input projection: one large MXU matmul, off the serial path.
    # (Tt, Bs, D) collapses to (Tt*Bs, D) without data movement since Bs is a sublane
    # multiple for the streamed dtype.
    x2 = x_ref[...].reshape(Tt * Bs, D).astype(cdt)
    xg = jnp.dot(x2, wih0_ref[...], preferred_element_type=jnp.float32)
    xg_s[...] = xg.reshape(Tt, Bs, G) + b0_ref[...].astype(jnp.float32)

    # Hoisted broadcast: JAX does not CSE broadcast_in_dim across unrolled steps.
    b1b = jnp.broadcast_to(b1_ref[...].astype(jnp.float32), (Bs, G))

    def sig(v):
        # Single-transcendental sigmoid (one EUP tanh instead of exp + reciprocal).
        return 0.5 * jnp.tanh(0.5 * v) + 0.5

    def gates(g):
        # PyTorch gate ordering along the 4H axis: [i, f, g, o].
        # (For production keep H a multiple of 128 so these slices stay lane-aligned.)
        return (sig(g[:, 0 * H:1 * H]), sig(g[:, 1 * H:2 * H]),
                jnp.tanh(g[:, 2 * H:3 * H]), sig(g[:, 3 * H:4 * H]))

    def step(t, carry):
        h0, c0, h1, c1 = carry

        # Layer-1 recurrent matmul only needs the previous-step h1: issue it first so it
        # overlaps layer 0 and avoids a per-step concat([h0, h1]) layout copy.
        g1_rec = jnp.dot(h1.astype(cdt), whh1, preferred_element_type=jnp.float32)

        # Layer 0 (input projection already hoisted into xg_s).
        g0 = xg_s[t] + jnp.dot(h0.astype(cdt), whh0, preferred_element_type=jnp.float32)
        i0, f0, gg0, o0 = gates(g0)
        c0 = f0 * c0 + i0 * gg0
        h0 = o0 * jnp.tanh(c0)

        # TODO(synk): inter-layer dropout (p=0.3) only fires in training; eval semantics here.
        g1 = g1_rec + b1b + jnp.dot(h0.astype(cdt), wih1,
                                    preferred_element_type=jnp.float32)
        i1, f1, gg1, o1 = gates(g1)
        c1 = f1 * c1 + i1 * gg1
        h1 = o1 * jnp.tanh(c1)

        hs_ref[t] = h1.astype(hs_ref.dtype)
        return (h0, c0, h1, c1)

    # Bounded unroll: Tt is the (small) per-chunk trip count picked by the wrapper.
    h0, c0, h1, c1 = lax.fori_loop(
        0, Tt, step, (h0_s[...], c0_s[...], h1_s[...], c1_s[...]), unroll=True)
    h0_s[...] = h0
    c0_s[...] = c0
    h1_s[...] = h1
    c1_s[...] = c1


def _pick_time_chunk(T, Bs, D, H, x_bytes, out_bytes,
                     budget_bytes=24 << 20, max_chunk=16):
    """Largest time chunk whose double-buffered blocks + xg scratch fit the budget."""
    per_step = Bs * (2 * D * x_bytes + 2 * H * out_bytes + 4 * H * 4)
    return int(max(1, min(T, max_chunk, budget_bytes // max(per_step, 1))))


def lstm_model_forward(x, lengths, p, *, time_chunk=None, batch_shards=1,
                       compute_dtype=jnp.float32):
    """x: (B, T, D) float32; lengths: (B,) int32.  Returns (B, T) float32 (eval mode)."""
    B, T, D = x.shape
    H = p["whh0T"].shape[0]
    G = 4 * H
    cdt = np.dtype(compute_dtype)
    out_dtype = compute_dtype                      # hs stream dtype (bf16 halves writeback)

    # ---- batch padding / sharding: per-shard batch must be a sublane multiple ----
    Bs = -(-B // batch_shards)
    Bs = ((Bs + 7) // 8) * 8
    Bp = Bs * batch_shards

    # Stream x in the compute dtype only when the in-kernel (Tt,Bs,D)->(Tt*Bs,D) collapse
    # stays tile-aligned for the packed dtype (bf16 packs 16 sublanes); otherwise f32.
    stream_bf16 = (cdt == np.dtype(jnp.bfloat16)) and (Bs % 16 == 0)
    x_stream_dtype = compute_dtype if stream_bf16 else jnp.float32

    # ---- time chunking (bounded unroll per chunk, double-buffered across the grid) ----
    if time_chunk is None:
        time_chunk = _pick_time_chunk(T, Bs, D, H,
                                      np.dtype(x_stream_dtype).itemsize,
                                      np.dtype(out_dtype).itemsize)
    Tt = int(min(time_chunk, T))
    Tp = -(-T // Tt) * Tt
    num_chunks = Tp // Tt

    x_tbd = jnp.swapaxes(x, 0, 1)                                   # (T, B, D)
    x_tbd = jnp.pad(x_tbd, ((0, Tp - T), (0, Bp - B), (0, 0)))      # (Tp, Bp, D)
    x_tbd = x_tbd.astype(x_stream_dtype)

    wih0 = p["wih0T"].astype(compute_dtype)
    whh0 = p["whh0T"].astype(compute_dtype)
    wih1 = p["wih1T"].astype(compute_dtype)
    whh1 = p["whh1T"].astype(compute_dtype)
    b0 = p["b0"].astype(jnp.float32)
    b1 = p["b1"].astype(jnp.float32)

    # VMEM budget: double-buffered streamed blocks + resident weights + scratch + headroom.
    est = (2 * Tt * Bs * (D * np.dtype(x_stream_dtype).itemsize
                          + H * np.dtype(out_dtype).itemsize)
           + (D + 3 * H) * G * cdt.itemsize + 2 * G * 4
           + Tt * Bs * G * 4 + 4 * Bs * H * 4
           + (2 << 20))
    vmem_limit = int(min(max(est, 32 << 20), 64 << 20))   # 64 MiB cap keeps v7x safe

    hs = pl.pallas_call(
        lstm_kernel,
        out_shape=jax.ShapeDtypeStruct((Tp, Bp, H), out_dtype),
        grid_spec=pltpu.PrefetchScalarGridSpec(
            num_scalar_prefetch=0,
            grid=(batch_shards, num_chunks),
            in_specs=[
                pl.BlockSpec((Tt, Bs, D), lambda s, i: (i, s, 0)),   # streamed x chunk
                pl.BlockSpec((D, G), lambda s, i: (0, 0)),           # W_ih layer0 (resident)
                pl.BlockSpec((H, G), lambda s, i: (0, 0)),           # W_hh layer0
                pl.BlockSpec((1, G), lambda s, i: (0, 0)),           # b_ih0 + b_hh0
                pl.BlockSpec((H, G), lambda s, i: (0, 0)),           # W_ih layer1
                pl.BlockSpec((H, G), lambda s, i: (0, 0)),           # W_hh layer1
                pl.BlockSpec((1, G), lambda s, i: (0, 0)),           # b_ih1 + b_hh1
            ],
            out_specs=pl.BlockSpec((Tt, Bs, H), lambda s, i: (i, s, 0)),
            scratch_shapes=[
                pltpu.VMEM((Tt, Bs, G), jnp.float32),   # per-chunk x @ Wih0 + b0
                pltpu.VMEM((Bs, H), jnp.float32),       # h0 carried across chunks
                pltpu.VMEM((Bs, H), jnp.float32),       # c0
                pltpu.VMEM((Bs, H), jnp.float32),       # h1
                pltpu.VMEM((Bs, H), jnp.float32),       # c1
            ],
        ),
        compiler_params=pltpu.CompilerParams(
            dimension_semantics=("parallel", "arbitrary"),
            vmem_limit_bytes=vmem_limit,
        ),
    )(x_tbd, wih0, whh0, b0, wih1, whh1, b1)

    # ---- wrapper post-work: pad_packed_sequence masking + fc (one lane-dense matmul) ----
    hs = jnp.swapaxes(hs[:T, :B, :], 0, 1).astype(jnp.float32)      # (B, T, H)
    mask = (jnp.arange(T)[None, :] < lengths[:, None])[..., None]
    hs = jnp.where(mask, hs, 0.0)
    return (hs @ p["wfcT"] + p["bfc"])[..., 0]                       # (B, T)


def ref_forward(x, lengths, p):
    """Pure-JAX reference with identical packed-sequence semantics (f32, high precision)."""
    B, T, D = x.shape
    H = p["whh0T"].shape[0]

    def cell(inp, h, c, wih, whh, b):
        g = (jnp.dot(inp, wih, precision=lax.Precision.HIGHEST)
             + jnp.dot(h, whh, precision=lax.Precision.HIGHEST) + b)
        i, f, gg, o = jnp.split(g, 4, axis=-1)
        c = jax.nn.sigmoid(f) * c + jax.nn.sigmoid(i) * jnp.tanh(gg)
        h = jax.nn.sigmoid(o) * jnp.tanh(c)
        return h, c

    def step(carry, x_t):
        h0, c0, h1, c1 = carry
        h0, c0 = cell(x_t, h0, c0, p["wih0T"], p["whh0T"], p["b0"])
        h1, c1 = cell(h0, h1, c1, p["wih1T"], p["whh1T"], p["b1"])
        return (h0, c0, h1, c1), h1

    init = tuple(jnp.zeros((B, H), jnp.float32) for _ in range(4))
    _, hs = lax.scan(step, init, jnp.swapaxes(x, 0, 1))              # (T, B, H)
    hs = jnp.swapaxes(hs, 0, 1)                                      # (B, T, H)
    mask = (jnp.arange(T)[None, :] < lengths[:, None])[..., None]
    hs = jnp.where(mask, hs, 0.0)
    return (hs @ p["wfcT"] + p["bfc"])[..., 0]                       # (B, T)


if __name__ == "__main__":
    B, T, D, H = 2, 8, 16, 32

    key = jax.random.PRNGKey(0)
    keys = jax.random.split(key, 11)
    scale = 1.0 / jnp.sqrt(H)

    def u(k, shape):
        return jax.random.uniform(k, shape, jnp.float32, -scale, scale)

    params = dict(
        wih0T=u(keys[0], (D, 4 * H)),
        whh0T=u(keys[1], (H, 4 * H)),
        b0=u(keys[2], (1, 4 * H)) + u(keys[3], (1, 4 * H)),
        wih1T=u(keys[4], (H, 4 * H)),
        whh1T=u(keys[5], (H, 4 * H)),
        b1=u(keys[6], (1, 4 * H)) + u(keys[7], (1, 4 * H)),
        wfcT=u(keys[8], (H, 1)),
        bfc=u(keys[9], (1, 1)),
    )

    x = jax.random.normal(keys[10], (B, T, D), jnp.float32)
    lengths = jnp.array([T, 5], dtype=jnp.int32)   # variable-length sequences, trailing padding

    ref = ref_forward(x, lengths, params)

    # 1) f32 matmuls, T-chunking that does NOT divide T (exercises time padding + carry).
    out = lstm_model_forward(x, lengths, params, time_chunk=3,
                             compute_dtype=jnp.float32)
    jax.block_until_ready(out)
    assert out.shape == (B, T)
    assert jnp.allclose(out, ref, atol=2e-3, rtol=2e-3), "f32 kernel/reference mismatch"

    # 2) bf16 matmul operands + bf16 hs stream (performance config), even T chunking.
    out_bf16 = lstm_model_forward(x, lengths, params, time_chunk=4,
                                  compute_dtype=jnp.bfloat16)
    jax.block_until_ready(out_bf16)
    assert jnp.allclose(out_bf16, ref, atol=5e-2, rtol=5e-2), "bf16 kernel/reference mismatch"

    # 3) batch sharded across a leading 'parallel' grid axis (v7x dual-TensorCore path).
    out_sh = lstm_model_forward(x, lengths, params, time_chunk=4, batch_shards=2,
                                compute_dtype=jnp.float32)
    jax.block_until_ready(out_sh)
    assert jnp.allclose(out_sh, ref, atol=2e-3, rtol=2e-3), "sharded kernel/reference mismatch"

    print("KERNEL_OK")
</pallas_src>

<mosaic_0001>
module attributes {stable_mosaic.version = 11 : i64} {
  func.func @lstm_kernel(%arg0: i32, %arg1: i32, %arg2: memref<3x8x16xf32, #tpu.memory_space<vmem>>, %arg3: memref<16x128xf32, #tpu.memory_space<vmem>>, %arg4: memref<32x128xf32, #tpu.memory_space<vmem>>, %arg5: memref<1x128xf32, #tpu.memory_space<vmem>>, %arg6: memref<32x128xf32, #tpu.memory_space<vmem>>, %arg7: memref<32x128xf32, #tpu.memory_space<vmem>>, %arg8: memref<1x128xf32, #tpu.memory_space<vmem>>, %arg9: memref<3x8x32xf32, #tpu.memory_space<vmem>>, %arg10: memref<3x8x128xf32, #tpu.memory_space<vmem>>, %arg11: memref<8x32xf32, #tpu.memory_space<vmem>>, %arg12: memref<8x32xf32, #tpu.memory_space<vmem>>, %arg13: memref<8x32xf32, #tpu.memory_space<vmem>>, %arg14: memref<8x32xf32, #tpu.memory_space<vmem>>) attributes {dimension_semantics = [#tpu.dimension_semantics<parallel>, #tpu.dimension_semantics<arbitrary>], iteration_bounds = array<i64: 1, 3>, scalar_prefetch = 0 : i64, scratch_operands = 5 : i64, tpu.core_type = #tpu.core_type<tc>, window_params = [{transform_indices = @transform_0, window_bounds = array<i64: 3, 8, 16>}, {pipeline_mode = #tpu.pipeline_mode<synchronous>, transform_indices = @transform_1, window_bounds = array<i64: 16, 128>}, {pipeline_mode = #tpu.pipeline_mode<synchronous>, transform_indices = @transform_2, window_bounds = array<i64: 32, 128>}, {pipeline_mode = #tpu.pipeline_mode<synchronous>, transform_indices = @transform_3, window_bounds = array<i64: 1, 128>}, {pipeline_mode = #tpu.pipeline_mode<synchronous>, transform_indices = @transform_4, window_bounds = array<i64: 32, 128>}, {pipeline_mode = #tpu.pipeline_mode<synchronous>, transform_indices = @transform_5, window_bounds = array<i64: 32, 128>}, {pipeline_mode = #tpu.pipeline_mode<synchronous>, transform_indices = @transform_6, window_bounds = array<i64: 1, 128>}, {transform_indices = @transform_7, window_bounds = array<i64: 3, 8, 32>}]} {
    %c0_i32 = arith.constant 0 : i32
    %0 = arith.cmpi eq, %arg1, %c0_i32 : i32
    %1 = arith.extui %0 : i1 to i32
    %c0_i32_0 = arith.constant 0 : i32
    %2 = arith.cmpi ne, %1, %c0_i32_0 : i32
    scf.if %2 {
      %cst_110 = arith.constant 0.000000e+00 : f32
      %252 = vector.broadcast %cst_110 : f32 to vector<8x32xf32>
      %c0_111 = arith.constant 0 : index
      %c0_112 = arith.constant 0 : index
      %253 = vector.load %arg11[%c0_111, %c0_112] : memref<8x32xf32, #tpu.memory_space<vmem>>, vector<8x32xf32>
      tpu.vector_store %arg11[%c0_111, %c0_112], %252 {strides = array<i32>} : memref<8x32xf32, #tpu.memory_space<vmem>>, vector<8x32xf32>,
      %cst_113 = arith.constant 0.000000e+00 : f32
      %254 = vector.broadcast %cst_113 : f32 to vector<8x32xf32>
      %c0_114 = arith.constant 0 : index
      %c0_115 = arith.constant 0 : index
      %255 = vector.load %arg12[%c0_114, %c0_115] : memref<8x32xf32, #tpu.memory_space<vmem>>, vector<8x32xf32>
      tpu.vector_store %arg12[%c0_114, %c0_115], %254 {strides = array<i32>} : memref<8x32xf32, #tpu.memory_space<vmem>>, vector<8x32xf32>,
      %cst_116 = arith.constant 0.000000e+00 : f32
      %256 = vector.broadcast %cst_116 : f32 to vector<8x32xf32>
      %c0_117 = arith.constant 0 : index
      %c0_118 = arith.constant 0 : index
      %257 = vector.load %arg13[%c0_117, %c0_118] : memref<8x32xf32, #tpu.memory_space<vmem>>, vector<8x32xf32>
      tpu.vector_store %arg13[%c0_117, %c0_118], %256 {strides = array<i32>} : memref<8x32xf32, #tpu.memory_space<vmem>>, vector<8x32xf32>,
      %cst_119 = arith.constant 0.000000e+00 : f32
      %258 = vector.broadcast %cst_119 : f32 to vector<8x32xf32>
      %c0_120 = arith.constant 0 : index
      %c0_121 = arith.constant 0 : index
      %259 = vector.load %arg14[%c0_120, %c0_121] : memref<8x32xf32, #tpu.memory_space<vmem>>, vector<8x32xf32>
      tpu.vector_store %arg14[%c0_120, %c0_121], %258 {strides = array<i32>} : memref<8x32xf32, #tpu.memory_space<vmem>>, vector<8x32xf32>,
    } else {
    }
    %c0 = arith.constant 0 : index
    %c0_1 = arith.constant 0 : index
    %3 = vector.load %arg4[%c0, %c0_1] : memref<32x128xf32, #tpu.memory_space<vmem>>, vector<32x128xf32>
    %c0_2 = arith.constant 0 : index
    %c0_3 = arith.constant 0 : index
    %4 = vector.load %arg6[%c0_2, %c0_3] : memref<32x128xf32, #tpu.memory_space<vmem>>, vector<32x128xf32>
    %c0_4 = arith.constant 0 : index
    %c0_5 = arith.constant 0 : index
    %5 = vector.load %arg7[%c0_4, %c0_5] : memref<32x128xf32, #tpu.memory_space<vmem>>, vector<32x128xf32>
    %c0_6 = arith.constant 0 : index
    %c0_7 = arith.constant 0 : index
    %c0_8 = arith.constant 0 : index
    %6 = vector.load %arg2[%c0_6, %c0_7, %c0_8] : memref<3x8x16xf32, #tpu.memory_space<vmem>>, vector<3x8x16xf32>
    %7 = vector.shape_cast %6 : vector<3x8x16xf32> to vector<24x16xf32>
    %c0_9 = arith.constant 0 : index
    %c0_10 = arith.constant 0 : index
    %8 = vector.load %arg3[%c0_9, %c0_10] : memref<16x128xf32, #tpu.memory_space<vmem>>, vector<16x128xf32>
    %cst = arith.constant dense<0.000000e+00> : vector<24x128xf32>
    %9 = tpu.matmul %7, %8, %cst {dimension_numbers = #tpu.dot_dimension_numbers<[1], [0], [0], [1], [0, 0, 1, 1], [], []>} : vector<24x16xf32>, vector<16x128xf32>, vector<24x128xf32> -> vector<24x128xf32>
    %10 = vector.shape_cast %9 : vector<24x128xf32> to vector<3x8x128xf32>
    %c0_11 = arith.constant 0 : index
    %c0_12 = arith.constant 0 : index
    %11 = vector.load %arg5[%c0_11, %c0_12] : memref<1x128xf32, #tpu.memory_space<vmem>>, vector<1x128xf32>
    %12 = vector.shape_cast %11 : vector<1x128xf32> to vector<1x1x128xf32>
    %13 = vector.broadcast %12 : vector<1x1x128xf32> to vector<3x8x128xf32>
    %14 = arith.addf %10, %13 : vector<3x8x128xf32>
    %c0_13 = arith.constant 0 : index
    %c0_14 = arith.constant 0 : index
    %c0_15 = arith.constant 0 : index
    %15 = vector.load %arg10[%c0_13, %c0_14, %c0_15] : memref<3x8x128xf32, #tpu.memory_space<vmem>>, vector<3x8x128xf32>
    tpu.vector_store %arg10[%c0_13, %c0_14, %c0_15], %14 {strides = array<i32>} : memref<3x8x128xf32, #tpu.memory_space<vmem>>, vector<3x8x128xf32>,
    %c0_16 = arith.constant 0 : index
    %c0_17 = arith.constant 0 : index
    %16 = vector.load %arg8[%c0_16, %c0_17] : memref<1x128xf32, #tpu.memory_space<vmem>>, vector<1x128xf32>
    %17 = vector.shape_cast %16 : vector<1x128xf32> to vector<1x128xf32>
    %18 = vector.broadcast %17 : vector<1x128xf32> to vector<8x128xf32>
    %c0_18 = arith.constant 0 : index
    %c0_19 = arith.constant 0 : index
    %19 = vector.load %arg11[%c0_18, %c0_19] : memref<8x32xf32, #tpu.memory_space<vmem>>, vector<8x32xf32>
    %c0_20 = arith.constant 0 : index
    %c0_21 = arith.constant 0 : index
    %20 = vector.load %arg12[%c0_20, %c0_21] : memref<8x32xf32, #tpu.memory_space<vmem>>, vector<8x32xf32>
    %c0_22 = arith.constant 0 : index
    %c0_23 = arith.constant 0 : index
    %21 = vector.load %arg13[%c0_22, %c0_23] : memref<8x32xf32, #tpu.memory_space<vmem>>, vector<8x32xf32>
    %c0_24 = arith.constant 0 : index
    %c0_25 = arith.constant 0 : index
    %22 = vector.load %arg14[%c0_24, %c0_25] : memref<8x32xf32, #tpu.memory_space<vmem>>, vector<8x32xf32>
    %c0_i32_26 = arith.constant 0 : i32
    %cst_27 = arith.constant dense<0.000000e+00> : vector<8x128xf32>
    %23 = tpu.matmul %21, %5, %cst_27 {dimension_numbers = #tpu.dot_dimension_numbers<[1], [0], [0], [1], [0, 0, 1, 1], [], []>} : vector<8x32xf32>, vector<32x128xf32>, vector<8x128xf32> -> vector<8x128xf32>
    %24 = arith.index_cast %c0_i32_26 : i32 to index
    %c0_28 = arith.constant 0 : index
    %c0_29 = arith.constant 0 : index
    %25 = vector.load %arg10[%24, %c0_28, %c0_29] : memref<3x8x128xf32, #tpu.memory_space<vmem>>, vector<1x8x128xf32>
    %26 = vector.shape_cast %25 : vector<1x8x128xf32> to vector<8x128xf32>
    %cst_30 = arith.constant dense<0.000000e+00> : vector<8x128xf32>
    %27 = tpu.matmul %19, %3, %cst_30 {dimension_numbers = #tpu.dot_dimension_numbers<[1], [0], [0], [1], [0, 0, 1, 1], [], []>} : vector<8x32xf32>, vector<32x128xf32>, vector<8x128xf32> -> vector<8x128xf32>
    %28 = arith.addf %26, %27 : vector<8x128xf32>
    %29 = vector.extract_strided_slice %28 {offsets = [0, 0], sizes = [8, 32], strides = [1, 1]} : vector<8x128xf32> to vector<8x32xf32>
    %cst_31 = arith.constant 5.000000e-01 : f32
    %30 = vector.broadcast %cst_31 : f32 to vector<8x32xf32>
    %31 = arith.mulf %30, %29 : vector<8x32xf32>
    %32 = math.tanh %31 : vector<8x32xf32>
    %cst_32 = arith.constant 5.000000e-01 : f32
    %33 = vector.broadcast %cst_32 : f32 to vector<8x32xf32>
    %34 = arith.mulf %33, %32 : vector<8x32xf32>
    %cst_33 = arith.constant 5.000000e-01 : f32
    %35 = vector.broadcast %cst_33 : f32 to vector<8x32xf32>
    %36 = arith.addf %34, %35 : vector<8x32xf32>
    %37 = vector.extract_strided_slice %28 {offsets = [0, 32], sizes = [8, 32], strides = [1, 1]} : vector<8x128xf32> to vector<8x32xf32>
    %cst_34 = arith.constant 5.000000e-01 : f32
    %38 = vector.broadcast %cst_34 : f32 to vector<8x32xf32>
    %39 = arith.mulf %38, %37 : vector<8x32xf32>
    %40 = math.tanh %39 : vector<8x32xf32>
    %cst_35 = arith.constant 5.000000e-01 : f32
    %41 = vector.broadcast %cst_35 : f32 to vector<8x32xf32>
    %42 = arith.mulf %41, %40 : vector<8x32xf32>
    %cst_36 = arith.constant 5.000000e-01 : f32
    %43 = vector.broadcast %cst_36 : f32 to vector<8x32xf32>
    %44 = arith.addf %42, %43 : vector<8x32xf32>
    %45 = vector.extract_strided_slice %28 {offsets = [0, 64], sizes = [8, 32], strides = [1, 1]} : vector<8x128xf32> to vector<8x32xf32>
    %46 = math.tanh %45 : vector<8x32xf32>
    %47 = vector.extract_strided_slice %28 {offsets = [0, 96], sizes = [8, 32], strides = [1, 1]} : vector<8x128xf32> to vector<8x32xf32>
    %cst_37 = arith.constant 5.000000e-01 : f32
    %48 = vector.broadcast %cst_37 : f32 to vector<8x32xf32>
    %49 = arith.mulf %48, %47 : vector<8x32xf32>
    %50 = math.tanh %49 : vector<8x32xf32>
    %cst_38 = arith.constant 5.000000e-01 : f32
    %51 = vector.broadcast %cst_38 : f32 to vector<8x32xf32>
    %52 = arith.mulf %51, %50 : vector<8x32xf32>
    %cst_39 = arith.constant 5.000000e-01 : f32
    %53 = vector.broadcast %cst_39 : f32 to vector<8x32xf32>
    %54 = arith.addf %52, %53 : vector<8x32xf32>
    %55 = arith.mulf %44, %20 : vector<8x32xf32>
    %56 = arith.mulf %36, %46 : vector<8x32xf32>
    %57 = arith.addf %55, %56 : vector<8x32xf32>
    %58 = math.tanh %57 : vector<8x32xf32>
    %59 = arith.mulf %54, %58 : vector<8x32xf32>
    %60 = arith.addf %23, %18 : vector<8x128xf32>
    %cst_40 = arith.constant dense<0.000000e+00> : vector<8x128xf32>
    %61 = tpu.matmul %59, %4, %cst_40 {dimension_numbers = #tpu.dot_dimension_numbers<[1], [0], [0], [1], [0, 0, 1, 1], [], []>} : vector<8x32xf32>, vector<32x128xf32>, vector<8x128xf32> -> vector<8x128xf32>
    %62 = arith.addf %60, %61 : vector<8x128xf32>
    %63 = vector.extract_strided_slice %62 {offsets = [0, 0], sizes = [8, 32], strides = [1, 1]} : vector<8x128xf32> to vector<8x32xf32>
    %cst_41 = arith.constant 5.000000e-01 : f32
    %64 = vector.broadcast %cst_41 : f32 to vector<8x32xf32>
    %65 = arith.mulf %64, %63 : vector<8x32xf32>
    %66 = math.tanh %65 : vector<8x32xf32>
    %cst_42 = arith.constant 5.000000e-01 : f32
    %67 = vector.broadcast %cst_42 : f32 to vector<8x32xf32>
    %68 = arith.mulf %67, %66 : vector<8x32xf32>
    %cst_43 = arith.constant 5.000000e-01 : f32
    %69 = vector.broadcast %cst_43 : f32 to vector<8x32xf32>
    %70 = arith.addf %68, %69 : vector<8x32xf32>
    %71 = vector.extract_strided_slice %62 {offsets = [0, 32], sizes = [8, 32], strides = [1, 1]} : vector<8x128xf32> to vector<8x32xf32>
    %cst_44 = arith.constant 5.000000e-01 : f32
    %72 = vector.broadcast %cst_44 : f32 to vector<8x32xf32>
    %73 = arith.mulf %72, %71 : vector<8x32xf32>
    %74 = math.tanh %73 : vector<8x32xf32>
    %cst_45 = arith.constant 5.000000e-01 : f32
    %75 = vector.broadcast %cst_45 : f32 to vector<8x32xf32>
    %76 = arith.mulf %75, %74 : vector<8x32xf32>
    %cst_46 = arith.constant 5.000000e-01 : f32
    %77 = vector.broadcast %cst_46 : f32 to vector<8x32xf32>
    %78 = arith.addf %76, %77 : vector<8x32xf32>
    %79 = vector.extract_strided_slice %62 {offsets = [0, 64], sizes = [8, 32], strides = [1, 1]} : vector<8x128xf32> to vector<8x32xf32>
    %80 = math.tanh %79 : vector<8x32xf32>
    %81 = vector.extract_strided_slice %62 {offsets = [0, 96], sizes = [8, 32], strides = [1, 1]} : vector<8x128xf32> to vector<8x32xf32>
    %cst_47 = arith.constant 5.000000e-01 : f32
    %82 = vector.broadcast %cst_47 : f32 to vector<8x32xf32>
    %83 = arith.mulf %82, %81 : vector<8x32xf32>
    %84 = math.tanh %83 : vector<8x32xf32>
    %cst_48 = arith.constant 5.000000e-01 : f32
    %85 = vector.broadcast %cst_48 : f32 to vector<8x32xf32>
    %86 = arith.mulf %85, %84 : vector<8x32xf32>
    %cst_49 = arith.constant 5.000000e-01 : f32
    %87 = vector.broadcast %cst_49 : f32 to vector<8x32xf32>
    %88 = arith.addf %86, %87 : vector<8x32xf32>
    %89 = arith.mulf %78, %22 : vector<8x32xf32>
    %90 = arith.mulf %70, %80 : vector<8x32xf32>
    %91 = arith.addf %89, %90 : vector<8x32xf32>
    %92 = math.tanh %91 : vector<8x32xf32>
    %93 = arith.mulf %88, %92 : vector<8x32xf32>
    %94 = arith.index_cast %c0_i32_26 : i32 to index
    %c0_50 = arith.constant 0 : index
    %c0_51 = arith.constant 0 : index
    %95 = vector.load %arg9[%94, %c0_50, %c0_51] : memref<3x8x32xf32, #tpu.memory_space<vmem>>, vector<1x8x32xf32>
    %96 = vector.shape_cast %95 : vector<1x8x32xf32> to vector<8x32xf32>
    %97 = vector.shape_cast %93 : vector<8x32xf32> to vector<1x8x32xf32>
    tpu.vector_store %arg9[%94, %c0_50, %c0_51], %97 {strides = array<i32>} : memref<3x8x32xf32, #tpu.memory_space<vmem>>, vector<1x8x32xf32>,
    %c1_i32 = arith.constant 1 : i32
    %cst_52 = arith.constant dense<0.000000e+00> : vector<8x128xf32>
    %98 = tpu.matmul %93, %5, %cst_52 {dimension_numbers = #tpu.dot_dimension_numbers<[1], [0], [0], [1], [0, 0, 1, 1], [], []>} : vector<8x32xf32>, vector<32x128xf32>, vector<8x128xf32> -> vector<8x128xf32>
    %99 = arith.index_cast %c1_i32 : i32 to index
    %c0_53 = arith.constant 0 : index
    %c0_54 = arith.constant 0 : index
    %100 = vector.load %arg10[%99, %c0_53, %c0_54] : memref<3x8x128xf32, #tpu.memory_space<vmem>>, vector<1x8x128xf32>
    %101 = vector.shape_cast %100 : vector<1x8x128xf32> to vector<8x128xf32>
    %cst_55 = arith.constant dense<0.000000e+00> : vector<8x128xf32>
    %102 = tpu.matmul %59, %3, %cst_55 {dimension_numbers = #tpu.dot_dimension_numbers<[1], [0], [0], [1], [0, 0, 1, 1], [], []>} : vector<8x32xf32>, vector<32x128xf32>, vector<8x128xf32> -> vector<8x128xf32>
    %103 = arith.addf %101, %102 : vector<8x128xf32>
    %104 = vector.extract_strided_slice %103 {offsets = [0, 0], sizes = [8, 32], strides = [1, 1]} : vector<8x128xf32> to vector<8x32xf32>
    %cst_56 = arith.constant 5.000000e-01 : f32
    %105 = vector.broadcast %cst_56 : f32 to vector<8x32xf32>
    %106 = arith.mulf %105, %104 : vector<8x32xf32>
    %107 = math.tanh %106 : vector<8x32xf32>
    %cst_57 = arith.constant 5.000000e-01 : f32
    %108 = vector.broadcast %cst_57 : f32 to vector<8x32xf32>
    %109 = arith.mulf %108, %107 : vector<8x32xf32>
    %cst_58 = arith.constant 5.000000e-01 : f32
    %110 = vector.broadcast %cst_58 : f32 to vector<8x32xf32>
    %111 = arith.addf %109, %110 : vector<8x32xf32>
    %112 = vector.extract_strided_slice %103 {offsets = [0, 32], sizes = [8, 32], strides = [1, 1]} : vector<8x128xf32> to vector<8x32xf32>
    %cst_59 = arith.constant 5.000000e-01 : f32
    %113 = vector.broadcast %cst_59 : f32 to vector<8x32xf32>
    %114 = arith.mulf %113, %112 : vector<8x32xf32>
    %115 = math.tanh %114 : vector<8x32xf32>
    %cst_60 = arith.constant 5.000000e-01 : f32
    %116 = vector.broadcast %cst_60 : f32 to vector<8x32xf32>
    %117 = arith.mulf %116, %115 : vector<8x32xf32>
    %cst_61 = arith.constant 5.000000e-01 : f32
    %118 = vector.broadcast %cst_61 : f32 to vector<8x32xf32>
    %119 = arith.addf %117, %118 : vector<8x32xf32>
    %120 = vector.extract_strided_slice %103 {offsets = [0, 64], sizes = [8, 32], strides = [1, 1]} : vector<8x128xf32> to vector<8x32xf32>
    %121 = math.tanh %120 : vector<8x32xf32>
    %122 = vector.extract_strided_slice %103 {offsets = [0, 96], sizes = [8, 32], strides = [1, 1]} : vector<8x128xf32> to vector<8x32xf32>
    %cst_62 = arith.constant 5.000000e-01 : f32
    %123 = vector.broadcast %cst_62 : f32 to vector<8x32xf32>
    %124 = arith.mulf %123, %122 : vector<8x32xf32>
    %125 = math.tanh %124 : vector<8x32xf32>
    %cst_63 = arith.constant 5.000000e-01 : f32
    %126 = vector.broadcast %cst_63 : f32 to vector<8x32xf32>
    %127 = arith.mulf %126, %125 : vector<8x32xf32>
    %cst_64 = arith.constant 5.000000e-01 : f32
    %128 = vector.broadcast %cst_64 : f32 to vector<8x32xf32>
    %129 = arith.addf %127, %128 : vector<8x32xf32>
    %130 = arith.mulf %119, %57 : vector<8x32xf32>
    %131 = arith.mulf %111, %121 : vector<8x32xf32>
    %132 = arith.addf %130, %131 : vector<8x32xf32>
    %133 = math.tanh %132 : vector<8x32xf32>
    %134 = arith.mulf %129, %133 : vector<8x32xf32>
    %135 = arith.addf %98, %18 : vector<8x128xf32>
    %cst_65 = arith.constant dense<0.000000e+00> : vector<8x128xf32>
    %136 = tpu.matmul %134, %4, %cst_65 {dimension_numbers = #tpu.dot_dimension_numbers<[1], [0], [0], [1], [0, 0, 1, 1], [], []>} : vector<8x32xf32>, vector<32x128xf32>, vector<8x128xf32> -> vector<8x128xf32>
    %137 = arith.addf %135, %136 : vector<8x128xf32>
    %138 = vector.extract_strided_slice %137 {offsets = [0, 0], sizes = [8, 32], strides = [1, 1]} : vector<8x128xf32> to vector<8x32xf32>
    %cst_66 = arith.constant 5.000000e-01 : f32
    %139 = vector.broadcast %cst_66 : f32 to vector<8x32xf32>
    %140 = arith.mulf %139, %138 : vector<8x32xf32>
    %141 = math.tanh %140 : vector<8x32xf32>
    %cst_67 = arith.constant 5.000000e-01 : f32
    %142 = vector.broadcast %cst_67 : f32 to vector<8x32xf32>
    %143 = arith.mulf %142, %141 : vector<8x32xf32>
    %cst_68 = arith.constant 5.000000e-01 : f32
    %144 = vector.broadcast %cst_68 : f32 to vector<8x32xf32>
    %145 = arith.addf %143, %144 : vector<8x32xf32>
    %146 = vector.extract_strided_slice %137 {offsets = [0, 32], sizes = [8, 32], strides = [1, 1]} : vector<8x128xf32> to vector<8x32xf32>
    %cst_69 = arith.constant 5.000000e-01 : f32
    %147 = vector.broadcast %cst_69 : f32 to vector<8x32xf32>
    %148 = arith.mulf %147, %146 : vector<8x32xf32>
    %149 = math.tanh %148 : vector<8x32xf32>
    %cst_70 = arith.constant 5.000000e-01 : f32
    %150 = vector.broadcast %cst_70 : f32 to vector<8x32xf32>
    %151 = arith.mulf %150, %149 : vector<8x32xf32>
    %cst_71 = arith.constant 5.000000e-01 : f32
    %152 = vector.broadcast %cst_71 : f32 to vector<8x32xf32>
    %153 = arith.addf %151, %152 : vector<8x32xf32>
    %154 = vector.extract_strided_slice %137 {offsets = [0, 64], sizes = [8, 32], strides = [1, 1]} : vector<8x128xf32> to vector<8x32xf32>
    %155 = math.tanh %154 : vector<8x32xf32>
    %156 = vector.extract_strided_slice %137 {offsets = [0, 96], sizes = [8, 32], strides = [1, 1]} : vector<8x128xf32> to vector<8x32xf32>
    %cst_72 = arith.constant 5.000000e-01 : f32
    %157 = vector.broadcast %cst_72 : f32 to vector<8x32xf32>
    %158 = arith.mulf %157, %156 : vector<8x32xf32>
    %159 = math.tanh %158 : vector<8x32xf32>
    %cst_73 = arith.constant 5.000000e-01 : f32
    %160 = vector.broadcast %cst_73 : f32 to vector<8x32xf32>
    %161 = arith.mulf %160, %159 : vector<8x32xf32>
    %cst_74 = arith.constant 5.000000e-01 : f32
    %162 = vector.broadcast %cst_74 : f32 to vector<8x32xf32>
    %163 = arith.addf %161, %162 : vector<8x32xf32>
    %164 = arith.mulf %153, %91 : vector<8x32xf32>
    %165 = arith.mulf %145, %155 : vector<8x32xf32>
    %166 = arith.addf %164, %165 : vector<8x32xf32>
    %167 = math.tanh %166 : vector<8x32xf32>
    %168 = arith.mulf %163, %167 : vector<8x32xf32>
    %169 = arith.index_cast %c1_i32 : i32 to index
    %c0_75 = arith.constant 0 : index
    %c0_76 = arith.constant 0 : index
    %170 = vector.load %arg9[%169, %c0_75, %c0_76] : memref<3x8x32xf32, #tpu.memory_space<vmem>>, vector<1x8x32xf32>
    %171 = vector.shape_cast %170 : vector<1x8x32xf32> to vector<8x32xf32>
    %172 = vector.shape_cast %168 : vector<8x32xf32> to vector<1x8x32xf32>
    tpu.vector_store %arg9[%169, %c0_75, %c0_76], %172 {strides = array<i32>} : memref<3x8x32xf32, #tpu.memory_space<vmem>>, vector<1x8x32xf32>,
    %c2_i32 = arith.constant 2 : i32
    %cst_77 = arith.constant dense<0.000000e+00> : vector<8x128xf32>
    %173 = tpu.matmul %168, %5, %cst_77 {dimension_numbers = #tpu.dot_dimension_numbers<[1], [0], [0], [1], [0, 0, 1, 1], [], []>} : vector<8x32xf32>, vector<32x128xf32>, vector<8x128xf32> -> vector<8x128xf32>
    %174 = arith.index_cast %c2_i32 : i32 to index
    %c0_78 = arith.constant 0 : index
    %c0_79 = arith.constant 0 : index
    %175 = vector.load %arg10[%174, %c0_78, %c0_79] : memref<3x8x128xf32, #tpu.memory_space<vmem>>, vector<1x8x128xf32>
    %176 = vector.shape_cast %175 : vector<1x8x128xf32> to vector<8x128xf32>
    %cst_80 = arith.constant dense<0.000000e+00> : vector<8x128xf32>
    %177 = tpu.matmul %134, %3, %cst_80 {dimension_numbers = #tpu.dot_dimension_numbers<[1], [0], [0], [1], [0, 0, 1, 1], [], []>} : vector<8x32xf32>, vector<32x128xf32>, vector<8x128xf32> -> vector<8x128xf32>
    %178 = arith.addf %176, %177 : vector<8x128xf32>
    %179 = vector.extract_strided_slice %178 {offsets = [0, 0], sizes = [8, 32], strides = [1, 1]} : vector<8x128xf32> to vector<8x32xf32>
    %cst_81 = arith.constant 5.000000e-01 : f32
    %180 = vector.broadcast %cst_81 : f32 to vector<8x32xf32>
    %181 = arith.mulf %180, %179 : vector<8x32xf32>
    %182 = math.tanh %181 : vector<8x32xf32>
    %cst_82 = arith.constant 5.000000e-01 : f32
    %183 = vector.broadcast %cst_82 : f32 to vector<8x32xf32>
    %184 = arith.mulf %183, %182 : vector<8x32xf32>
    %cst_83 = arith.constant 5.000000e-01 : f32
    %185 = vector.broadcast %cst_83 : f32 to vector<8x32xf32>
    %186 = arith.addf %184, %185 : vector<8x32xf32>
    %187 = vector.extract_strided_slice %178 {offsets = [0, 32], sizes = [8, 32], strides = [1, 1]} : vector<8x128xf32> to vector<8x32xf32>
    %cst_84 = arith.constant 5.000000e-01 : f32
    %188 = vector.broadcast %cst_84 : f32 to vector<8x32xf32>
    %189 = arith.mulf %188, %187 : vector<8x32xf32>
    %190 = math.tanh %189 : vector<8x32xf32>
    %cst_85 = arith.constant 5.000000e-01 : f32
    %191 = vector.broadcast %cst_85 : f32 to vector<8x32xf32>
    %192 = arith.mulf %191, %190 : vector<8x32xf32>
    %cst_86 = arith.constant 5.000000e-01 : f32
    %193 = vector.broadcast %cst_86 : f32 to vector<8x32xf32>
    %194 = arith.addf %192, %193 : vector<8x32xf32>
    %195 = vector.extract_strided_slice %178 {offsets = [0, 64], sizes = [8, 32], strides = [1, 1]} : vector<8x128xf32> to vector<8x32xf32>
    %196 = math.tanh %195 : vector<8x32xf32>
    %197 = vector.extract_strided_slice %178 {offsets = [0, 96], sizes = [8, 32], strides = [1, 1]} : vector<8x128xf32> to vector<8x32xf32>
    %cst_87 = arith.constant 5.000000e-01 : f32
    %198 = vector.broadcast %cst_87 : f32 to vector<8x32xf32>
    %199 = arith.mulf %198, %197 : vector<8x32xf32>
    %200 = math.tanh %199 : vector<8x32xf32>
    %cst_88 = arith.constant 5.000000e-01 : f32
    %201 = vector.broadcast %cst_88 : f32 to vector<8x32xf32>
    %202 = arith.mulf %201, %200 : vector<8x32xf32>
    %cst_89 = arith.constant 5.000000e-01 : f32
    %203 = vector.broadcast %cst_89 : f32 to vector<8x32xf32>
    %204 = arith.addf %202, %203 : vector<8x32xf32>
    %205 = arith.mulf %194, %132 : vector<8x32xf32>
    %206 = arith.mulf %186, %196 : vector<8x32xf32>
    %207 = arith.addf %205, %206 : vector<8x32xf32>
    %208 = math.tanh %207 : vector<8x32xf32>
    %209 = arith.mulf %204, %208 : vector<8x32xf32>
    %210 = arith.addf %173, %18 : vector<8x128xf32>
    %cst_90 = arith.constant dense<0.000000e+00> : vector<8x128xf32>
    %211 = tpu.matmul %209, %4, %cst_90 {dimension_numbers = #tpu.dot_dimension_numbers<[1], [0], [0], [1], [0, 0, 1, 1], [], []>} : vector<8x32xf32>, vector<32x128xf32>, vector<8x128xf32> -> vector<8x128xf32>
    %212 = arith.addf %210, %211 : vector<8x128xf32>
    %213 = vector.extract_strided_slice %212 {offsets = [0, 0], sizes = [8, 32], strides = [1, 1]} : vector<8x128xf32> to vector<8x32xf32>
    %cst_91 = arith.constant 5.000000e-01 : f32
    %214 = vector.broadcast %cst_91 : f32 to vector<8x32xf32>
    %215 = arith.mulf %214, %213 : vector<8x32xf32>
    %216 = math.tanh %215 : vector<8x32xf32>
    %cst_92 = arith.constant 5.000000e-01 : f32
    %217 = vector.broadcast %cst_92 : f32 to vector<8x32xf32>
    %218 = arith.mulf %217, %216 : vector<8x32xf32>
    %cst_93 = arith.constant 5.000000e-01 : f32
    %219 = vector.broadcast %cst_93 : f32 to vector<8x32xf32>
    %220 = arith.addf %218, %219 : vector<8x32xf32>
    %221 = vector.extract_strided_slice %212 {offsets = [0, 32], sizes = [8, 32], strides = [1, 1]} : vector<8x128xf32> to vector<8x32xf32>
    %cst_94 = arith.constant 5.000000e-01 : f32
    %222 = vector.broadcast %cst_94 : f32 to vector<8x32xf32>
    %223 = arith.mulf %222, %221 : vector<8x32xf32>
    %224 = math.tanh %223 : vector<8x32xf32>
    %cst_95 = arith.constant 5.000000e-01 : f32
    %225 = vector.broadcast %cst_95 : f32 to vector<8x32xf32>
    %226 = arith.mulf %225, %224 : vector<8x32xf32>
    %cst_96 = arith.constant 5.000000e-01 : f32
    %227 = vector.broadcast %cst_96 : f32 to vector<8x32xf32>
    %228 = arith.addf %226, %227 : vector<8x32xf32>
    %229 = vector.extract_strided_slice %212 {offsets = [0, 64], sizes = [8, 32], strides = [1, 1]} : vector<8x128xf32> to vector<8x32xf32>
    %230 = math.tanh %229 : vector<8x32xf32>
    %231 = vector.extract_strided_slice %212 {offsets = [0, 96], sizes = [8, 32], strides = [1, 1]} : vector<8x128xf32> to vector<8x32xf32>
    %cst_97 = arith.constant 5.000000e-01 : f32
    %232 = vector.broadcast %cst_97 : f32 to vector<8x32xf32>
    %233 = arith.mulf %232, %231 : vector<8x32xf32>
    %234 = math.tanh %233 : vector<8x32xf32>
    %cst_98 = arith.constant 5.000000e-01 : f32
    %235 = vector.broadcast %cst_98 : f32 to vector<8x32xf32>
    %236 = arith.mulf %235, %234 : vector<8x32xf32>
    %cst_99 = arith.constant 5.000000e-01 : f32
    %237 = vector.broadcast %cst_99 : f32 to vector<8x32xf32>
    %238 = arith.addf %236, %237 : vector<8x32xf32>
    %239 = arith.mulf %228, %166 : vector<8x32xf32>
    %240 = arith.mulf %220, %230 : vector<8x32xf32>
    %241 = arith.addf %239, %240 : vector<8x32xf32>
    %242 = math.tanh %241 : vector<8x32xf32>
    %243 = arith.mulf %238, %242 : vector<8x32xf32>
    %244 = arith.index_cast %c2_i32 : i32 to index
    %c0_100 = arith.constant 0 : index
    %c0_101 = arith.constant 0 : index
    %245 = vector.load %arg9[%244, %c0_100, %c0_101] : memref<3x8x32xf32, #tpu.memory_space<vmem>>, vector<1x8x32xf32>
    %246 = vector.shape_cast %245 : vector<1x8x32xf32> to vector<8x32xf32>
    %247 = vector.shape_cast %243 : vector<8x32xf32> to vector<1x8x32xf32>
    tpu.vector_store %arg9[%244, %c0_100, %c0_101], %247 {strides = array<i32>} : memref<3x8x32xf32, #tpu.memory_space<vmem>>, vector<1x8x32xf32>,
    %c3_i32 = arith.constant 3 : i32
    %c0_102 = arith.constant 0 : index
    %c0_103 = arith.constant 0 : index
    %248 = vector.load %arg11[%c0_102, %c0_103] : memref<8x32xf32, #tpu.memory_space<vmem>>, vector<8x32xf32>
    tpu.vector_store %arg11[%c0_102, %c0_103], %209 {strides = array<i32>} : memref<8x32xf32, #tpu.memory_space<vmem>>, vector<8x32xf32>,
    %c0_104 = arith.constant 0 : index
    %c0_105 = arith.constant 0 : index
    %249 = vector.load %arg12[%c0_104, %c0_105] : memref<8x32xf32, #tpu.memory_space<vmem>>, vector<8x32xf32>
    tpu.vector_store %arg12[%c0_104, %c0_105], %207 {strides = array<i32>} : memref<8x32xf32, #tpu.memory_space<vmem>>, vector<8x32xf32>,
    %c0_106 = arith.constant 0 : index
    %c0_107 = arith.constant 0 : index
    %250 = vector.load %arg13[%c0_106, %c0_107] : memref<8x32xf32, #tpu.memory_space<vmem>>, vector<8x32xf32>
    tpu.vector_store %arg13[%c0_106, %c0_107], %243 {strides = array<i32>} : memref<8x32xf32, #tpu.memory_space<vmem>>, vector<8x32xf32>,
    %c0_108 = arith.constant 0 : index
    %c0_109 = arith.constant 0 : index
    %251 = vector.load %arg14[%c0_108, %c0_109] : memref<8x32xf32, #tpu.memory_space<vmem>>, vector<8x32xf32>
    tpu.vector_store %arg14[%c0_108, %c0_109], %241 {strides = array<i32>} : memref<8x32xf32, #tpu.memory_space<vmem>>, vector<8x32xf32>,
    return
  }
  func.func @transform_0(%arg0: i32, %arg1: i32) -> (i32, i32, i32) {
    %c0_i32 = arith.constant 0 : i32
    %c0_i32_0 = arith.constant 0 : i32
    return %arg1, %arg0, %c0_i32 : i32, i32, i32
  }
  func.func @transform_1(%arg0: i32, %arg1: i32) -> (i32, i32) {
    %c0_i32 = arith.constant 0 : i32
    %c0_i32_0 = arith.constant 0 : i32
    %c0_i32_1 = arith.constant 0 : i32
    return %c0_i32, %c0_i32_0 : i32, i32
  }
  func.func @transform_2(%arg0: i32, %arg1: i32) -> (i32, i32) {
    %c0_i32 = arith.constant 0 : i32
    %c0_i32_0 = arith.constant 0 : i32
    %c0_i32_1 = arith.constant 0 : i32
    return %c0_i32, %c0_i32_0 : i32, i32
  }
  func.func @transform_3(%arg0: i32, %arg1: i32) -> (i32, i32) {
    %c0_i32 = arith.constant 0 : i32
    %c0_i32_0 = arith.constant 0 : i32
    %c0_i32_1 = arith.constant 0 : i32
    return %c0_i32, %c0_i32_0 : i32, i32
  }
  func.func @transform_4(%arg0: i32, %arg1: i32) -> (i32, i32) {
    %c0_i32 = arith.constant 0 : i32
    %c0_i32_0 = arith.constant 0 : i32
    %c0_i32_1 = arith.constant 0 : i32
    return %c0_i32, %c0_i32_0 : i32, i32
  }
  func.func @transform_5(%arg0: i32, %arg1: i32) -> (i32, i32) {
    %c0_i32 = arith.constant 0 : i32
    %c0_i32_0 = arith.constant 0 : i32
    %c0_i32_1 = arith.constant 0 : i32
    return %c0_i32, %c0_i32_0 : i32, i32
  }
  func.func @transform_6(%arg0: i32, %arg1: i32) -> (i32, i32) {
    %c0_i32 = arith.constant 0 : i32
    %c0_i32_0 = arith.constant 0 : i32
    %c0_i32_1 = arith.constant 0 : i32
    return %c0_i32, %c0_i32_0 : i32, i32
  }
  func.func @transform_7(%arg0: i32, %arg1: i32) -> (i32, i32, i32) {
    %c0_i32 = arith.constant 0 : i32
    %c0_i32_0 = arith.constant 0 : i32
    return %arg1, %arg0, %c0_i32 : i32, i32, i32
  }
}

</mosaic_0001>

<bundles_post_ra>
// kernel: tpu_custom_call.1
= control target key start
LH: loop header
LB: loop body
LE: loop exit
PB: predicated region body
PF: predicated region fallthrough
CT: control target
= control target key end

     0   :  { %s2668_s0 = inlined_call_operand.hbm [shape: f32[9,8,16], index: 0, kind: input, shape index: {}]   ;;  %s2669_s1 = inlined_call_operand.hbm [shape: f32[16,128], index: 1, kind: input, shape index: {}]   ;;  %s2670_s2 = inlined_call_operand.hbm [shape: f32[32,128], index: 2, kind: input, shape index: {}]   ;;  %s2671_s3 = inlined_call_operand.vmem [shape: f32[1,128], index: 3, kind: input, shape index: {}]   ;;  %s2672_s4 = inlined_call_operand.hbm [shape: f32[32,128], index: 4, kind: input, shape index: {}]   ;;  %s2673_s5 = inlined_call_operand.hbm [shape: f32[32,128], index: 5, kind: input, shape index: {}]   ;;  %s2674_s6 = inlined_call_operand.vmem [shape: f32[1,128], index: 6, kind: input, shape index: {}]   ;;  %s2675_s7 = inlined_call_operand.hbm [shape: f32[9,8,32], index: 7, kind: output, shape index: {}]  }
   0x1   :  { %2683 = sst [smem:[#allocation23_spill]] %s2674_s6 }
   0x2   :  { %2684 = sst [smem:[#allocation24_spill]] %s2675_s7 }
   0x3   :  { %12 = vsyncpa [#allocation8], 0 }
   0x4   :  { %14 = vsyncpa [#allocation8 + $0x1], 0 }
   0x5   :  { %15 = vsyncpa [#allocation11], 0 }
   0x6   :  { %16 = vsyncpa [#allocation14], 0 }
   0x7   :  { %17 = vsyncpa [#allocation9], 0 }
   0x8   :  { %19 = vsyncpa [#allocation9 + $0x1], 0  ;;  %s2202_s24 = smov 0   ;;  %s2204_s25 = smov 0  }
   0x9   :  { %s2206_s26 = smov 0   ;;  %s2208_s27 = smov 0  }
   0xa   :  { %s2210_s28 = smov 0   ;;  %s2212_s29 = smov 0  }
   0xb LB: > { %2685 = sst [smem:[#allocation21_spill]] %s2123_s24  ;;  %s1489_s30 = sadd.s32 4294967295, %s2143_s29   ;;  %s2143_s29 = sphi %s2212_s29, %s25_s29   ;;  %s2139_s28 = sphi %s2210_s28, %s2709_s28   ;;  %s2135_s27 = sphi %s2208_s27, %s2708_s27   ;;  %s2131_s26 = sphi %s2206_s26, %s2707_s26   ;;  %s2127_s25 = sphi %s2204_s25, %s2706_s25   ;;  %s2123_s24 = sphi %s2202_s24, %s2705_s24  }
   0xc   : > { %s1490_s8 = sadd.s32 4294967294, %s2143_s29   ;;  %p59_p0 = scmp.ne.s32.totalorder %s2127_s25, %s2123_s24 }
   0xd   : > { %p2236_p1 = scmp.eq.s32.totalorder %s1489_s30, 0  ;;  %p2240_p2 = scmp.eq.s32.totalorder %s1489_s30, 2 }
   0xe   : > { %p217_p3 = scmp.eq.s32.totalorder %s1490_s8, 2  ;;  %p1491_p5 = scmp.ge.s32.totalorder %s2143_s29, 1 }
   0xf   : > { %s2686_s9 = scalar_select %p2236_p1, 1, 0 }
  0x10   : > { %s2687_s10 = scalar_select %p2240_p2, 1, 0 }
  0x11   : > { %p2246_p4 = por %p2236_p1, %p59_p0  ;;  %p2251_p6 = por %p217_p3, %p59_p0 }
  0x12   : > { %p224_p7 = scmp.lt.s32.totalorder %s2143_s29, 4  ;;  %s2145_s14 = smov [#allocation10]  }
  0x13   : > { %s2688_s11 = scalar_select %p2246_p4, 1, 0 }
  0x14   : > { %s2689_s12 = scalar_select %p2251_p6, 1, 0 }
  0x15   : > { %p2256_p8 = pnand %p1491_p5, %p224_p7  ;;  %s236_s15 = sshll.u32 %s2145_s14, 4  ;;  %s2260_s15 = int_to_ptr.vmem [resolvable:$true] %s236_s15 }
  0x16   : > { %2690 = sst [smem:[#allocation22_spill]] %s2689_s12  ;;  %s2146_s17 = smov [#allocation13]  }
  0x17   : > { %s2691_s13 = scalar_select %p2256_p8, 1, 0 }
  0x18   : > { %p1781_p9 = pneg %p2256_p8  ;;  %s265_s18 = sshll.u32 %s2146_s17, 4  ;;  %s2270_s18 = int_to_ptr.vmem [resolvable:$true] %s265_s18 }
  0x19   : > { %s2147_s19 = smov [#allocation12]   ;;  %s1911_s23 = scalar_lea.hbm %s2669_s1, 256 }
  0x1a   : > { %p2266_p10 = pnand %p1781_p9, %p2236_p1  ;;  %s2272_s20 = sshll.u32 %s2147_s19, 4  ;;  %s250_s20 = int_to_ptr.vmem [resolvable:$true] %s2272_s20 }
  0x1b   : > { %p1912_p11 = scmp.ne.s32.totalorder %s2669_s1, %s1911_s23  ;;  %p1918_p3 = scmp.lt.u32.totalorder %s1911_s23, %s2669_s1 }
  0x1c   : > { %p2282_p12 = pneg %p2266_p10 }
  0x1e   : > { %p1914_p13 = pnand %p2282_p12, %p1912_p11 }
  0x20   : > { %p1915_p0 = pneg %p1914_p13 }
  0x22   : > { %p1920_p5 = pnand %p1918_p3, %p1915_p0 }
  0x24   : > { %1923 = shalt.err (!%p1920_p5)
}
  0x25   : > { %s1924_s21 = scalar_lea.vmem %s2260_s15, 256  ;;  %p1932_p1 = scmp.lt.s32.totalorder %s2260_s15, %s2260_s15 }
  0x26   : > { %p1925_p7 = scmp.ne.s32.totalorder %s2260_s15, %s1924_s21  ;;  %p1933_p4 = scmp.lt.s32.totalorder %s1924_s21, %s1924_s21 }
  0x28   : > { %p1927_p9 = pnand %p1925_p7, %p2282_p12  ;;  %p1934_p11 = por %p1933_p4, %p1932_p1 }
  0x2a   : > { %p1928_p6 = pneg %p1927_p9 }
  0x2c   : > { %p1935_p13 = pnand %p1934_p11, %p1928_p6 }
  0x2e   : > { %1938 = shalt.err (!%p1935_p13)
}
  0x2f   : > { %s2148_s22 = smov 128   ;;  %s2149_s23 = smov 8  }
  0x30   : > { %1784 = dma.hbm_to_vmem [thread:$0]  (!%p2266_p10), %s2669_s1, 256, %s2260_s15, [#allocation11], %s2148_s22, %s2148_s22, %s2149_s23  }
  0x31   : > { %s1939_s21 = scalar_lea.hbm %s2672_s4, 512 }
  0x32   : > { %p1940_p1 = scmp.ne.s32.totalorder %s2672_s4, %s1939_s21  ;;  %p1946_p0 = scmp.lt.u32.totalorder %s1939_s21, %s2672_s4 }
  0x34   : > { %p1942_p4 = pnand %p1940_p1, %p2282_p12 }
  0x36   : > { %p1943_p6 = pneg %p1942_p4 }
  0x38   : > { %p1948_p3 = pnand %p1946_p0, %p1943_p6 }
  0x3a   : > { %1951 = shalt.err (!%p1948_p3)
}
  0x3b   : > { %s1952_s15 = scalar_lea.vmem %s2270_s18, 512  ;;  %p1960_p11 = scmp.lt.s32.totalorder %s2270_s18, %s2270_s18 }
  0x3c   : > { %p1953_p5 = scmp.ne.s32.totalorder %s2270_s18, %s1952_s15  ;;  %p1961_p13 = scmp.lt.s32.totalorder %s1952_s15, %s1952_s15 }
  0x3e   : > { %p1955_p7 = pnand %p1953_p5, %p2282_p12  ;;  %p1962_p1 = por %p1961_p13, %p1960_p11 }
  0x40   : > { %p1956_p9 = pneg %p1955_p7 }
  0x42   : > { %p1963_p4 = pnand %p1962_p1, %p1956_p9 }
  0x44   : > { %1966 = shalt.err (!%p1963_p4)
}
  0x45   : > { %1790 = dma.hbm_to_vmem [thread:$0]  (!%p2266_p10), %s2672_s4, 512, %s2270_s18, [#allocation14], %s2148_s22, %s2148_s22, %s2149_s23  }
  0x46   : > { %s1967_s30 = scalar_lea.hbm %s2670_s2, 512 }
  0x47   : > { %p1968_p6 = scmp.ne.s32.totalorder %s2670_s2, %s1967_s30  ;;  %p1974_p5 = scmp.lt.u32.totalorder %s1967_s30, %s2670_s2 }
  0x49   : > { %p1970_p0 = pnand %p1968_p6, %p2282_p12 }
  0x4b   : > { %p1971_p3 = pneg %p1970_p0 }
  0x4d   : > { %p1976_p7 = pnand %p1974_p5, %p1971_p3 }
  0x4f   : > { %1979 = shalt.err (!%p1976_p7)
}
  0x50   : > { %s1980_s15 = scalar_lea.vmem %s250_s20, 512  ;;  %p1988_p1 = scmp.lt.s32.totalorder %s250_s20, %s250_s20 }
  0x51   : > { %p1981_p9 = scmp.ne.s32.totalorder %s250_s20, %s1980_s15  ;;  %p1989_p4 = scmp.lt.s32.totalorder %s1980_s15, %s1980_s15 }
  0x53   : > { %p1983_p11 = pnand %p1981_p9, %p2282_p12  ;;  %p1990_p8 = por %p1989_p4, %p1988_p1 }
  0x55   : > { %p1984_p13 = pneg %p1983_p11 }
  0x57   : > { %p1991_p2 = pnand %p1990_p8, %p1984_p13 }
  0x59   : > { %1994 = shalt.err (!%p1991_p2)
}
  0x5a   : > { %1787 = dma.hbm_to_vmem [thread:$0]  (!%p2266_p10), %s2670_s2, 512, %s250_s20, [#allocation11], %s2148_s22, %s2148_s22, %s2149_s23  }
  0x5b   : > { %s2150_s7 = smov [#allocation15]   ;;  %s1995_s8 = scalar_lea.hbm %s2673_s5, 512 }
  0x5c   : > { %s278_s24 = sshll.u32 %s2150_s7, 4  ;;  %p1996_p2 = scmp.ne.s32.totalorder %s2673_s5, %s1995_s8  ;;  %s279_s24 = int_to_ptr.vmem [resolvable:$true] %s278_s24 }
  0x5d   : > { %p2002_p0 = scmp.lt.u32.totalorder %s1995_s8, %s2673_s5 }
  0x5e   : > { %p1998_p8 = pnand %p1996_p2, %p2282_p12 }
  0x60   : > { %p1999_p6 = pneg %p1998_p8 }
  0x62   : > { %p2004_p3 = pnand %p2002_p0, %p1999_p6 }
  0x64   : > { %2007 = shalt.err (!%p2004_p3)
}
  0x65   : > { %s2008_s20 = scalar_lea.vmem %s279_s24, 512  ;;  %p2016_p11 = scmp.lt.s32.totalorder %s279_s24, %s279_s24 }
  0x66   : > { %p2009_p5 = scmp.ne.s32.totalorder %s279_s24, %s2008_s20  ;;  %p2017_p13 = scmp.lt.s32.totalorder %s2008_s20, %s2008_s20 }
  0x68   : > { %p2011_p7 = pnand %p2009_p5, %p2282_p12  ;;  %p2018_p1 = por %p2017_p13, %p2016_p11 }
  0x6a   : > { %p2012_p9 = pneg %p2011_p7 }
  0x6c   : > { %p2019_p4 = pnand %p2018_p1, %p2012_p9 }
  0x6e   : > { %2022 = shalt.err (!%p2019_p4)
}
  0x6f   : > { %1793 = dma.hbm_to_vmem [thread:$0]  (!%p2266_p10), %s2673_s5, 512, %s279_s24, [#allocation14], %s2148_s22, %s2148_s22, %s2149_s23  }
  0x70   : > { %s34_s14 = sadd.s32 1, %s2139_s28  ;;  %s46_s16 = sadd.s32 1, %s2131_s26 }
  0x71   : > { %p35_p12 = scmp.ge.s32.totalorder %s34_s14, 3  ;;  %p53_p2 = scmp.ne.s32.totalorder %s2131_s26, %s2127_s25 }
  0x72   : > { %p54_p8 = scmp.eq.s32.totalorder %s2143_s29, 0  ;;  %p1806_p6 = scmp.lt.s32.totalorder %s2143_s29, 3 }
  0x73   : > { %s2711_s14 = smov (%p35_p12, %s34_s14), 0  ;;  %p2694_p3 = scmp.ne.s32.totalorder %s2687_s10, 0 }
  0x74   : > { %p55_p0 = por %p54_p8, %p53_p2  ;;  %s41_s12 = ssub.s32 %s2139_s28, %s2711_s14 }
  0x75   : > { %p2385_p5 = por %p2694_p3, %p53_p2  ;;  %s295_s30 = sand.u32 1, %s2131_s26  }
  0x76   : > { %p44_p7 = scmp.eq.s32.totalorder %s41_s12, 0  ;;  %s1759_s24 = smul.u32 24, %s295_s30 }
  0x77   : > { %p2392_p10 = pnand %p1806_p6, %p55_p0  ;;  %s1523_s19 = smul.u32 384, %s2139_s28 }
  0x78   : > { %s2397_s17 = scalar_select %p44_p7, %s2131_s26, %s46_s16  }
  0x79   : > { %s299_s21 = scalar_lea.vmem [#allocation7], %s1759_s24  ;;  %s2403_s18 = scalar_lea.hbm %s2668_s0, %s1523_s19 }
  0x7a   : > { %s307_s15 = sshll.u32 %s299_s21, 4  ;;  %s2407_s6 = scalar_lea.sflag [#allocation8], %s295_s30  ;;  %s2405_s15 = int_to_ptr.vmem [resolvable:$true] %s307_s15 }
  0x7b   : > { %s2023_s12 = scalar_lea.hbm %s2403_s18, 384  ;;  %p2025_p11 = pneg %p2392_p10 }
  0x7c   : > { %p2024_p9 = scmp.ne.s32.totalorder %s2403_s18, %s2023_s12  ;;  %s2028_s19 = scalar_lea.hbm %s2668_s0, 1152 }
  0x7d   : > { %p2029_p4 = scmp.lt.u32.totalorder %s2403_s18, %s2668_s0  ;;  %p2030_p12 = scmp.lt.u32.totalorder %s2028_s19, %s2023_s12 }
  0x7e   : > { %p2026_p13 = pnand %p2025_p11, %p2024_p9  ;;  %p2032_p8 = scmp.lt.u32.totalorder %s2023_s12, %s2403_s18 }
  0x7f   : > { %p2031_p2 = por %p2030_p12, %p2029_p4 }
  0x80   : > { %p2027_p1 = pneg %p2026_p13 }
  0x81   : > { %p2033_p6 = por %p2032_p8, %p2031_p2 }
  0x83   : > { %p2034_p0 = pnand %p2033_p6, %p2027_p1 }
  0x85   : > { %2037 = shalt.err (!%p2034_p0)
}
  0x86   : > { %s2038_s30 = scalar_lea.vmem %s2405_s15, 384  ;;  %s2151_s20 = smov [#allocation7]  }
  0x87   : > { %p2039_p3 = scmp.ne.s32.totalorder %s2405_s15, %s2038_s30  ;;  %s2043_s16 = sshll.u32 %s2151_s20, 4  ;;  %s2044_s16 = int_to_ptr.vmem [resolvable:$false] %s2043_s16 }
  0x88   : > { %s2045_s24 = scalar_lea.vmem %s2044_s16, 768  ;;  %p2046_p13 = scmp.lt.s32.totalorder %s2405_s15, %s2044_s16 }
  0x89   : > { %p2041_p7 = pnand %p2039_p3, %p2025_p11  ;;  %p2047_p4 = scmp.lt.s32.totalorder %s2045_s24, %s2038_s30 }
  0x8b   : > { %p2042_p9 = pneg %p2041_p7  ;;  %p2048_p12 = por %p2047_p4, %p2046_p13 }
  0x8d   : > { %p2049_p2 = pnand %p2048_p12, %p2042_p9 }
  0x8f   : > { %2052 = shalt.err (!%p2049_p2)
}
  0x90   : > { %1797 = dma.hbm_to_vmem [thread:$0]  (!%p2392_p10), %s2403_s18, 384, %s2405_s15, %s2407_s6, %s2148_s22, %s2148_s22, %s2149_s23  }
  0x91   : > { %p2697_p11 = scmp.ne.s32.totalorder %s2691_s13, 0 }
  0x92   : > { %s2441_s12 = sand.u32 (!%p2697_p11), 1, %s2127_s25   ;;  %p2698_p1 = scmp.ne.s32.totalorder (!%p2697_p11), %s2688_s11, 0 }
  0x93   : > { %319 = sbr.rel (%p2697_p11) target bundleno = 3018 (0xbca), region = 48  ;;  %s322_s21 = scalar_lea.sflag (!%p2697_p11), [#allocation8], %s2441_s12 }
  0x94   : > { %s1760_s19 = smul.u32 (!%p2697_p11), 24, %s2441_s12 }
  0x96   : > { %s2445_s10 = scalar_lea.vmem (!%p2697_p11), [#allocation7], %s1760_s19 }
  0x9a   : > { %2106 = dma.done.wait (%p2698_p1), %s322_s21, 384  }
  0x9b   : > { %2108 = vsyncadd (%p2698_p1), %s322_s21, 4294966912  ;;  %p2699_p10 = scmp.ne.s32.totalorder %s2686_s9, 0 }
  0x9d   : > { %2110 = dma.done.wait (%p2699_p10), [#allocation11], 768  }
  0x9e   : > { %2112 = vsyncadd (%p2699_p10), [#allocation11], 4294966528 }
  0x9f   : > { %2114 = dma.done.wait (%p2699_p10), [#allocation14], 1024  }
  0xa0   : > { %2116 = vsyncadd (%p2699_p10), [#allocation14], 4294966272  ;;  %s2459_s13 = scalar_lea.vmem [#allocation16], %s1760_s19  ;;  %p1503_p8 = scmp.ne.s32.totalorder %s2135_s27, 0 }
  0xa1   : > { %vm378_vm0 = vcmask (!%p1503_p8), 261120   ;;  %v2152_v0 = vmov (!%p1503_p8), 0.0  }
  0xa2   : > { %377 = sbr.rel (%p1503_p8) target bundleno = 169 (0xa9), region = 72  ;;  %379 = vst.msk [vmem:[#allocation3] sm:$0xff] (!%p1503_p8), %vm378_vm0, %v2152_v0  ;;  %380 = vst.msk [vmem:[#allocation4] sm:$0xff] (!%p1503_p8), %vm378_vm0, %v2152_v0 }
  0xa3   : > { %381 = vst.msk [vmem:[#allocation5] sm:$0xff] (!%p1503_p8), %vm378_vm0, %v2152_v0  ;;  %382 = vst.msk [vmem:[#allocation6] sm:$0xff] (!%p1503_p8), %vm378_vm0, %v2152_v0 }
  0xa9 PF: > { %v383_v1 = vld [vmem:[#allocation12] sm:$0xff]  ;;  %v384_v2 = vld [vmem:[#allocation12 + $0x8] sm:$0xff]  ;;  %v398_v3 = vld [vmem:[#allocation10] sm:$0xff]  ;;  %v2153_v4 = vmov 0.0|0.0   ;;  %vm2154_vm1 = vmmov 0   ;;  %v2155_v9 = vmov 0.0  }
  0xaa   : > { %1690 = vmatprep.subr.bf16.mxu0 %v2153_v4  ;;  %1687 = vmatprep.subr.bf16.mxu1 %v2153_v4  ;;  %v2464_v5 = vpack.c.bf16 %v384_v2, %v383_v1  ;;  %v399_v6 = vld [vmem:[#allocation10 + $0x8] sm:$0xff]  ;;  %v385_v7 = vld [vmem:[#allocation12 + $0x10] sm:$0xff]  ;;  %vm400_vm2 = vcmask 130048   ;;  %v510_v13 = vld [vmem:[#allocation3] sm:$0xff]  ;;  %vm515_vm3 = vcmask 261120   ;;  %s2156_s22 = smov 64  }
  0xab   : > { %v1688_v8 = vpack.c.bf16 %v399_v6, %v398_v3  ;;  %1579 = vmatprep.mubr.msk.f32.mxu1 %vm2154_vm1, %v2155_v9  ;;  %v386_v10 = vld [vmem:[#allocation12 + $0x18] sm:$0xff]  ;;  %1596 = vmatprep.mubr.msk.f32.mxu0 %vm2154_vm1, %v2155_v9  ;;  %v2491_v14 = vld [vmem:[%s2671_s3] ss:$0 sm:$0xff]  ;;  %v511_v22 = vld [vmem:[#allocation4] sm:$0xff]  ;;  %s2157_s23 = smov 32   ;;  %s2700_s18 = sld [smem:[#allocation23_spill]] }
  0xac   : > { %1692 = vmatpush3.bf16.msra.mxu0 %v2464_v5  ;;  %v2471_v11 = vpack.c.bf16 %v386_v10, %v385_v7  ;;  %v395_v12 = vld [vmem:[%s2445_s10] sm:$0xff]  ;;  %v392_v34 = vld [vmem:[#allocation15 + $0x8] sm:$0xff]  ;;  %v393_v37 = vld [vmem:[#allocation15 + $0x10] sm:$0xff]  ;;  %s2158_s6 = smov 96   ;;  %s1524_s30 = smul.u32 384, %s2135_s27 }
  0xad   : > { %1689 = vmatpush3.bf16.msra.mxu1 %v1688_v8  ;;  %1693 = vmatprep.subr.bf16.mxu0 %v2153_v4  ;;  %v391_v33 = vld [vmem:[#allocation15] sm:$0xff]  ;;  %v394_v38 = vld [vmem:[#allocation15 + $0x18] sm:$0xff]  ;;  %v397_v39 = vld [vmem:[%s2445_s10 + $0x10] sm:$0xff]  ;;  %s1366_s20 = sshll.u32 %s2459_s13, 4  ;;  %s2701_s19 = sld [smem:[#allocation24_spill]]  ;;  %s2616_s20 = int_to_ptr.vmem [resolvable:$true] %s1366_s20 }
  0xae   : > { %1696 = vmatprep.subr.bf16.mxu1 %v2153_v4  ;;  %v396_v35 = vld [vmem:[%s2445_s10 + $0x8] sm:$0xff]  ;;  %v2501_v36 = vpack.c.bf16 %v392_v34, %v391_v33  ;;  %v2508_v40 = vpack.c.bf16 %v394_v38, %v393_v37  ;;  %v512_v43 = vld [vmem:[#allocation5] sm:$0xff]  ;;  %v390_v46 = vld [vmem:[#allocation13 + $0x18] sm:$0xff]  ;;  %s1352_s10 = scalar_lea.sflag [#allocation9], %s2441_s12  ;;  %s2053_s9 = scalar_lea.vmem %s2616_s20, 384 }
  0xaf   : > { %v387_v41 = vld [vmem:[#allocation13] sm:$0xff]  ;;  %v388_v42 = vld [vmem:[#allocation13 + $0x8] sm:$0xff]  ;;  %v389_v45 = vld [vmem:[#allocation13 + $0x10] sm:$0xff]  ;;  %p2054_p6 = scmp.ne.s32.totalorder %s2616_s20, %s2053_s9  ;;  %s2159_s27 = smov [#allocation16]  }
  0xb0   : > { %1580 = vmatmul.mubr.msk.f32.vlgmr.msra.gmra.mrb[0].mxu1 %vm400_vm2, %v395_v12  ;;  %1695 = vmatpush3.bf16.msra.mxu0 %v2471_v11  ;;  %v2515_v44 = vpack.c.bf16 %v388_v42, %v387_v41  ;;  %v2521_v48 = vpack.c.bf16 %v390_v46, %v389_v45  ;;  %v513_v2 = vld [vmem:[#allocation6] sm:$0xff]  ;;  %s2057_s11 = sshll.u32 %s2159_s27, 4  ;;  %s2058_s11 = int_to_ptr.vmem [resolvable:$false] %s2057_s11 }
  0xb1   : > { %1582 = vmatprep.mubr.msk.f32.mxu1 %vm2154_vm1, %v2155_v9  ;;  %1708 = vmatprep.subr.bf16.mxu0 %v2153_v4  ;;  %v2548_v56 = vld [vmem:[%s2700_s18] ss:$0 sm:$0xff]  ;;  %p2055_p0 = pnand %p2054_p6, %p2385_p5  ;;  %p2060_p7 = scmp.lt.s32.totalorder %s2616_s20, %s2058_s11 }
  0xb2   : > { %1698 = vmatpush3.bf16.msra.mxu1 %v2501_v36 }
  0xb3   : > { %1597 = vmatmul.mubr.msk.f32.vlgmr.msra.gmra.mrb[0].mxu0 %vm515_vm3, %v510_v13  ;;  %1699 = vmatprep.subr.bf16.mxu1 %v2153_v4  ;;  %s2614_s21 = scalar_lea.hbm %s2701_s19, %s1524_s30  ;;  %p2056_p3 = pneg %p2055_p0 }
  0xb4   : > { %1710 = vmatpush3.bf16.msra.mxu0 %v2464_v5  ;;  %1629 = vmatprep.mubr.msk.f32.mxu0 %vm2154_vm1, %v2155_v9 }
  0xb5   : > { %1711 = vmatprep.subr.bf16.mxu0 %v2153_v4  ;;  %1583 = vmatmul.mubr.msk.f32.gmra.mrb[2].mxu1 %vm400_vm2, %v396_v35 }
  0xb6   : > { %1585 = vmatprep.mubr.msk.f32.mxu1 %vm2154_vm1, %v2155_v9  ;;  %1701 = vmatpush3.bf16.msra.mxu1 %v2508_v40 }
  0xb7   : > { %1702 = vmatprep.subr.bf16.mxu1 %v2153_v4 }
  0xb8   : > { %1713 = vmatpush3.bf16.msra.mxu0 %v2471_v11 }
  0xb9   : > { %1726 = vmatprep.subr.bf16.mxu0 %v2153_v4  ;;  %1586 = vmatmul.mubr.msk.f32.gmra.mrb[4].mxu1 %vm400_vm2, %v397_v39 }
  0xba   : > { %1607 = vmatprep.mubr.msk.f32.mxu1 %vm2154_vm1, %v2155_v9 }
  0xbd   : > { %1608 = vmatmul.mubr.msk.f32.vlgmr.msra.gmra.mrb[6].mxu1 %vm515_vm3, %v512_v43 }
  0xbe   : > { %1704 = vmatpush3.bf16.msra.mxu1 %v2515_v44  ;;  %1618 = vmatprep.mubr.msk.f32.mxu1 %vm2154_vm1, %v2155_v9 }
  0xbf   : > { %1705 = vmatprep.subr.bf16.mxu1 %v2153_v4 }
  0xc2   : > { %1707 = vmatpush3.bf16.msra.mxu1 %v2521_v48 }
  0xc3   : > { %1714 = vmatprep.subr.bf16.mxu1 %v2153_v4 }
 0x183   : > { %v476_v15 = vpop.f32.mrb[0].mxu1 }
 0x184   : > { %v497_v16 = vadd.f32 %v2491_v14, %v476_v15  ;;  %v1581_v17 = vpop.f32.mrb[1].mxu1 }
 0x186   : > { %v585_v18 = vpop.f32.mrb[0].mxu0 }
 0x187   : > { %v589_v19 = vadd.f32 %v585_v18, %v497_v16  ;;  %v1598_v20 = vpop.f32.mrb[1].mxu0 }
 0x188   : > { %v481_v51 = vpop.f32.mrb[2].mxu1 }
 0x189   : > { %1875 = vtanh.f32 %v589_v19  ;;  %v590_v23 = vmul.f32 0.5, %v589_v19  ;;  %v1584_v52 = vpop.f32.mrb[3].mxu1  ;;  %v498_v57 = vadd.f32 %v2491_v14, %v481_v51 }
 0x18b   : > { %1877 = vtanh.f32 %v590_v23 }
 0x18c   : > { %v2529_v53 = vpop.f32.mrb[4].mxu1 }
 0x18d   : > { %v1587_v54 = vpop.f32.mrb[5].mxu1  ;;  %v499_v33 = vadd.f32 %v2491_v14, %v2529_v53 }
 0x193   : > { %v1876_v21 = vpop.eup %1875 }
 0x194   : > { %601 = vrot.lane.b32.xlu0 %v1876_v21, %s2156_s22 }
 0x195   : > { %v1878_v24 = vpop.eup %1877 }
 0x196   : > { %v592_v25 = vmul.f32 0.5, %v1878_v24 }
 0x198   : > { %596 = vrot.lane.b32.xlu0 %v511_v22, %s2157_s23  ;;  %v593_v26 = vadd.f32 0.5, %v592_v25 }
 0x206   : > { %v602_v27 = vpop.permute.xlu0 %601 }
 0x207   : > { %v604_v28 = vmul.f32 %v602_v27, %v593_v26 }
 0x209   : > { %606 = vrot.lane.b32.xlu1 %v604_v28, %s2157_s23 }
 0x20a   : > { %v597_v29 = vpop.permute.xlu0 %596 }
 0x20b   : > { %v599_v30 = vmul.f32 %v597_v29, %v593_v26 }
 0x27b   : > { %v607_v31 = vpop.permute.xlu1 %606 }
 0x27c   : > { %v2497_v32 = vadd.f32 %v607_v31, %v599_v30 }
 0x27e   : > { %1879 = vtanh.f32 %v2497_v32 }
 0x288   : > { %v1880_v47 = vpop.eup %1879 }
 0x289   : > { %612 = vrot.lane.b32.xlu1 %v1880_v47, %s2156_s22 }
 0x2fb   : > { %v613_v49 = vpop.permute.xlu1 %612 }
 0x2fc   : > { %v615_v50 = vmul.f32 %v613_v49, %v593_v26 }
 0x2fe   : > { %690 = vrot.lane.b32.xlu0 %v615_v50, %s2157_s23 }
 0x370   : > { %v691_v55 = vpop.permute.xlu0 %690 }
 0x371   : > { %1619 = vmatmul.mubr.msk.f32.vlgmr.msra.gmra.mrb[6].mxu1 %vm515_vm3, %v691_v55  ;;  %1630 = vmatmul.mubr.msk.f32.vlgmr.msra.gmra.mrb[2].mxu0 %vm515_vm3, %v691_v55 }
 0x372   : > { %1716 = vmatpush3.bf16.msra.mxu1 %v2501_v36  ;;  %1728 = vmatpush3.bf16.msra.mxu0 %v2464_v5 }
 0x373   : > { %1717 = vmatprep.subr.bf16.mxu1 %v2153_v4  ;;  %1729 = vmatprep.subr.bf16.mxu0 %v2153_v4 }
 0x374   : > { %1640 = vmatprep.mubr.msk.f32.mxu1 %vm2154_vm1, %v2155_v9  ;;  %1662 = vmatprep.mubr.msk.f32.mxu0 %vm2154_vm1, %v2155_v9 }
 0x376   : > { %1719 = vmatpush3.bf16.msra.mxu1 %v2508_v40  ;;  %1731 = vmatpush3.bf16.msra.mxu0 %v2471_v11 }
 0x377   : > { %1720 = vmatprep.subr.bf16.mxu1 %v2153_v4  ;;  %1732 = vmatprep.subr.bf16.mxu0 %v2153_v4 }
 0x444   : > { %v760_v58 = vpop.f32.mrb[6].mxu1  ;;  %v864_v59 = vpop.f32.mrb[2].mxu0 }
 0x445   : > { %v1750_v60 = vadd.f32 %v2548_v56, %v760_v58  ;;  %v868_v61 = vadd.f32 %v864_v59, %v498_v57  ;;  %v1620_v62 = vpop.f32.mrb[7].mxu1  ;;  %v1631_v63 = vpop.f32.mrb[3].mxu0 }
 0x447   : > { %1881 = vtanh.f32 %v1750_v60  ;;  %v765_v3 = vmul.f32 0.5, %v1750_v60  ;;  %v869_v5 = vmul.f32 0.5, %v868_v61 }
 0x448   : > { %1883 = vtanh.f32 %v868_v61 }
 0x449   : > { %1885 = vtanh.f32 %v765_v3 }
 0x44a   : > { %1887 = vtanh.f32 %v869_v5 }
 0x451   : > { %v1882_v0 = vpop.eup %1881 }
 0x452   : > { %v1884_v1 = vpop.eup %1883  ;;  %776 = vrot.lane.b32.xlu1 %v1882_v0, %s2156_s22 }
 0x453   : > { %876 = vrot.lane.b32.xlu0 %v1884_v1, %s2156_s22  ;;  %v1886_v6 = vpop.eup %1885 }
 0x454   : > { %v1888_v7 = vpop.eup %1887  ;;  %v767_v8 = vmul.f32 0.5, %v1886_v6 }
 0x455   : > { %v871_v10 = vmul.f32 0.5, %v1888_v7 }
 0x456   : > { %771 = vrot.lane.b32.xlu1 %v513_v2, %s2157_s23  ;;  %v768_v11 = vadd.f32 0.5, %v767_v8 }
 0x457   : > { %v872_v13 = vadd.f32 0.5, %v871_v10 }
 0x459   : > { %v874_v21 = vmul.f32 %v872_v13, %v2497_v32 }
 0x4c4   : > { %v777_v12 = vpop.permute.xlu1 %776 }
 0x4c5   : > { %v779_v15 = vmul.f32 %v777_v12, %v768_v11  ;;  %v877_v16 = vpop.permute.xlu0 %876 }
 0x4c6   : > { %v879_v17 = vmul.f32 %v877_v16, %v872_v13 }
 0x4c7   : > { %781 = vrot.lane.b32.xlu0 %v779_v15, %s2157_s23 }
 0x4c8   : > { %881 = vrot.lane.b32.xlu1 %v879_v17, %s2157_s23  ;;  %v772_v18 = vpop.permute.xlu1 %771 }
 0x4c9   : > { %v774_v19 = vmul.f32 %v772_v18, %v768_v11 }
 0x539   : > { %v782_v20 = vpop.permute.xlu0 %781 }
 0x53a   : > { %v2558_v22 = vadd.f32 %v782_v20, %v774_v19  ;;  %v882_v23 = vpop.permute.xlu1 %881 }
 0x53b   : > { %v884_v24 = vadd.f32 %v882_v23, %v874_v21 }
 0x53c   : > { %1889 = vtanh.f32 %v2558_v22 }
 0x53d   : > { %1891 = vtanh.f32 %v884_v24 }
 0x546   : > { %v1890_v25 = vpop.eup %1889 }
 0x547   : > { %v1892_v26 = vpop.eup %1891  ;;  %787 = vrot.lane.b32.xlu0 %v1890_v25, %s2156_s22 }
 0x548   : > { %887 = vrot.lane.b32.xlu1 %v1892_v26, %s2156_s22 }
 0x5b9   : > { %v788_v27 = vpop.permute.xlu0 %787 }
 0x5ba   : > { %v790_v28 = vmul.f32 %v788_v27, %v768_v11  ;;  %v888_v29 = vpop.permute.xlu1 %887 }
 0x5bb   : > { %v890_v30 = vmul.f32 %v888_v29, %v872_v13 }
 0x5bc   : > { %792 = vrot.lane.b32.xlu0 %v790_v28, %s2157_s23 }
 0x5bd   : > { %964 = vrot.lane.b32.xlu1 %v890_v30, %s2157_s23 }
 0x62e   : > { %v793_v31 = vpop.permute.xlu0 %792 }
 0x62f   : > { %795 = vst.msk [vmem:[%s2459_s13] sm:$0xff] %vm515_vm3, %v793_v31  ;;  %v965_v32 = vpop.permute.xlu1 %964  ;;  %1641 = vmatmul.mubr.msk.f32.vlgmr.msra.gmra.mrb[8].mxu1 %vm515_vm3, %v793_v31 }
 0x630   : > { %1722 = vmatpush3.bf16.msra.mxu1 %v2515_v44  ;;  %1663 = vmatmul.mubr.msk.f32.vlgmr.msra.gmra.mrb[4].mxu0 %vm515_vm3, %v965_v32 }
 0x631   : > { %1723 = vmatprep.subr.bf16.mxu1 %v2153_v4  ;;  %1651 = vmatprep.mubr.msk.f32.mxu1 %vm2154_vm1, %v2155_v9 }
 0x632   : > { %1734 = vmatpush3.bf16.msra.mxu0 %v2501_v36  ;;  %1673 = vmatprep.mubr.msk.f32.mxu0 %vm2154_vm1, %v2155_v9 }
 0x633   : > { %1735 = vmatprep.subr.bf16.mxu0 %v2153_v4 }
 0x634   : > { %1725 = vmatpush3.bf16.msra.mxu1 %v2521_v48 }
 0x636   : > { %1737 = vmatpush3.bf16.msra.mxu0 %v2508_v40 }
 0x637   : > { %1652 = vmatmul.mubr.msk.f32.vlgmr.msra.gmra.mrb[8].mxu1 %vm515_vm3, %v965_v32  ;;  %1738 = vmatprep.subr.bf16.mxu0 %v2153_v4 }
 0x703   : > { %v1135_v34 = vpop.f32.mrb[4].mxu0 }
 0x704   : > { %v1139_v35 = vadd.f32 %v1135_v34, %v499_v33  ;;  %v1664_v37 = vpop.f32.mrb[5].mxu0 }
 0x706   : > { %1893 = vtanh.f32 %v1139_v35  ;;  %v1140_v42 = vmul.f32 0.5, %v1139_v35 }
 0x70a   : > { %v1034_v36 = vpop.f32.mrb[8].mxu1 }
 0x70b   : > { %v1751_v38 = vadd.f32 %v2548_v56, %v1034_v36  ;;  %v1653_v39 = vpop.f32.mrb[9].mxu1 }
 0x70d   : > { %1895 = vtanh.f32 %v1751_v38  ;;  %v1039_v43 = vmul.f32 0.5, %v1751_v38 }
 0x70e   : > { %1897 = vtanh.f32 %v1140_v42 }
 0x70f   : > { %1899 = vtanh.f32 %v1039_v43 }
 0x710   : > { %v1894_v41 = vpop.eup %1893 }
 0x711   : > { %1147 = vrot.lane.b32.xlu1 %v1894_v41, %s2156_s22 }
 0x717   : > { %v1896_v40 = vpop.eup %1895 }
 0x718   : > { %1046 = vrot.lane.b32.xlu0 %v1896_v40, %s2156_s22  ;;  %v1898_v14 = vpop.eup %1897 }
 0x719   : > { %v1142_v45 = vmul.f32 0.5, %v1898_v14  ;;  %v1900_v46 = vpop.eup %1899 }
 0x71a   : > { %v1041_v51 = vmul.f32 0.5, %v1900_v46 }
 0x71b   : > { %v1143_v47 = vadd.f32 0.5, %v1142_v45 }
 0x71c   : > { %v1042_v52 = vadd.f32 0.5, %v1041_v51 }
 0x71d   : > { %v1145_v55 = vmul.f32 %v1143_v47, %v884_v24 }
 0x71e   : > { %v1044_v59 = vmul.f32 %v1042_v52, %v2558_v22 }
 0x783   : > { %v1148_v49 = vpop.permute.xlu1 %1147 }
 0x784   : > { %v1150_v50 = vmul.f32 %v1148_v49, %v1143_v47 }
 0x786   : > { %1152 = vrot.lane.b32.xlu1 %v1150_v50, %s2157_s23 }
 0x78a   : > { %v1047_v53 = vpop.permute.xlu0 %1046 }
 0x78b   : > { %v1049_v54 = vmul.f32 %v1047_v53, %v1042_v52 }
 0x78d   : > { %1051 = vrot.lane.b32.xlu0 %v1049_v54, %s2157_s23 }
 0x7f8   : > { %v1153_v57 = vpop.permute.xlu1 %1152 }
 0x7f9   : > { %v1155_v58 = vadd.f32 %v1153_v57, %v1145_v55 }
 0x7fb   : > { %1901 = vtanh.f32 %v1155_v58 }
 0x7ff   : > { %v1052_v60 = vpop.permute.xlu0 %1051 }
 0x800   : > { %v1054_v61 = vadd.f32 %v1052_v60, %v1044_v59 }
 0x802   : > { %1903 = vtanh.f32 %v1054_v61 }
 0x805   : > { %v1902_v62 = vpop.eup %1901 }
 0x806   : > { %1158 = vrot.lane.b32.xlu1 %v1902_v62, %s2156_s22 }
 0x80c   : > { %v1904_v63 = vpop.eup %1903 }
 0x80d   : > { %1057 = vrot.lane.b32.xlu0 %v1904_v63, %s2156_s22 }
 0x878   : > { %v1159_v0 = vpop.permute.xlu1 %1158 }
 0x879   : > { %v1161_v1 = vmul.f32 %v1159_v0, %v1143_v47 }
 0x87b   : > { %1235 = vrot.lane.b32.xlu1 %v1161_v1, %s2157_s23 }
 0x87f   : > { %v1058_v2 = vpop.permute.xlu0 %1057 }
 0x880   : > { %v1060_v3 = vmul.f32 %v1058_v2, %v1042_v52 }
 0x882   : > { %1062 = vrot.lane.b32.xlu0 %v1060_v3, %s2157_s23 }
 0x8ed   : > { %v1236_v5 = vpop.permute.xlu1 %1235 }
 0x8ee   : > { %1339 = vst.msk [vmem:[#allocation3] sm:$0xff] %vm515_vm3, %v1236_v5 }
 0x8f4   : > { %v1063_v6 = vpop.permute.xlu0 %1062 }
 0x8f5   : > { %1515 = vst.msk [vmem:[%s2459_s13 + $0x8] sm:$0xff] %vm515_vm3, %v1063_v6  ;;  %1674 = vmatmul.mubr.msk.f32.vlgmr.msra.gmra.mrb[6].mxu0 %vm515_vm3, %v1063_v6 }
 0x8f6   : > { %1740 = vmatpush3.bf16.msra.mxu0 %v2515_v44  ;;  %1684 = vmatprep.mubr.msk.f32.mxu0 %vm2154_vm1, %v2155_v9 }
 0x8f7   : > { %1741 = vmatprep.subr.bf16.mxu0 %v2153_v4 }
 0x8fa   : > { %1743 = vmatpush3.bf16.msra.mxu0 %v2521_v48 }
 0x8fd   : > { %1685 = vmatmul.mubr.msk.f32.vlgmr.msra.gmra.mrb[6].mxu0 %vm515_vm3, %v1236_v5 }
 0x9d0   : > { %v1305_v7 = vpop.f32.mrb[6].mxu0 }
 0x9d1   : > { %v1752_v8 = vadd.f32 %v2548_v56, %v1305_v7  ;;  %v1686_v10 = vpop.f32.mrb[7].mxu0 }
 0x9d3   : > { %1905 = vtanh.f32 %v1752_v8  ;;  %v1310_v12 = vmul.f32 0.5, %v1752_v8 }
 0x9d5   : > { %1907 = vtanh.f32 %v1310_v12 }
 0x9dd   : > { %v1906_v11 = vpop.eup %1905 }
 0x9de   : > { %1317 = vrot.lane.b32.xlu0 %v1906_v11, %s2156_s22 }
 0x9df   : > { %v1908_v44 = vpop.eup %1907 }
 0x9e0   : > { %v1312_v13 = vmul.f32 0.5, %v1908_v44 }
 0x9e2   : > { %v1313_v15 = vadd.f32 0.5, %v1312_v13 }
 0x9e4   : > { %v1315_v4 = vmul.f32 %v1313_v15, %v1054_v61 }
 0xa50   : > { %v1318_v9 = vpop.permute.xlu0 %1317 }
 0xa51   : > { %v1320_v16 = vmul.f32 %v1318_v9, %v1313_v15 }
 0xa53   : > { %1322 = vrot.lane.b32.xlu1 %v1320_v16, %s2157_s23 }
 0xac5   : > { %v1323_v48 = vpop.permute.xlu1 %1322 }
 0xac6   : > { %v1325_v17 = vadd.f32 %v1323_v48, %v1315_v4 }
 0xac8   : > { %1909 = vtanh.f32 %v1325_v17 }
 0xad2   : > { %v1910_v56 = vpop.eup %1909 }
 0xad3   : > { %1328 = vrot.lane.b32.xlu0 %v1910_v56, %s2156_s22  ;;  %s2059_s22 = scalar_lea.vmem %s2058_s11, 768 }
 0xad4   : > { %p2061_p9 = scmp.lt.s32.totalorder %s2059_s22, %s2053_s9 }
 0xad6   : > { %p2062_p13 = por %p2061_p9, %p2060_p7 }
 0xad7   : > { %1341 = vrot.lane.b32.xlu0 %v1155_v58, %s2158_s6 }
 0xad8   : > { %p2063_p4 = pnand %p2062_p13, %p2056_p3 }
 0xb45   : > { %v1329_v18 = vpop.permute.xlu0 %1328 }
 0xb46   : > { %v1331_v19 = vmul.f32 %v1329_v18, %v1313_v15 }
 0xb48   : > { %1333 = vrot.lane.b32.xlu1 %v1331_v19, %s2157_s23 }
 0xb49   : > { %v1342_v20 = vpop.permute.xlu0 %1341 }
 0xb4a   : > { %1344 = vst.msk [vmem:[#allocation4] sm:$0xff] %vm515_vm3, %v1342_v20 }
 0xb4c   : > { %1347 = vrot.lane.b32.xlu1 %v1325_v17, %s2158_s6 }
 0xbba   : > { %v1334_v21 = vpop.permute.xlu1 %1333 }
 0xbbb   : > { %1519 = vst.msk [vmem:[%s2459_s13 + $0x10] sm:$0xff] %vm515_vm3, %v1334_v21  ;;  %1345 = vst.msk [vmem:[#allocation5] sm:$0xff] %vm515_vm3, %v1334_v21 }
 0xbbc   : > { %2066 = shalt.err (!%p2063_p4)
}
 0xbbd   : > { %s2067_s13 = scalar_lea.hbm %s2614_s21, 384  ;;  %s2071_s15 = scalar_lea.hbm %s2701_s19, 1152 }
 0xbbe   : > { %p2068_p12 = scmp.ne.s32.totalorder %s2614_s21, %s2067_s13  ;;  %p2072_p1 = scmp.lt.u32.totalorder %s2614_s21, %s2701_s19 }
 0xbbf   : > { %p2073_p10 = scmp.lt.u32.totalorder %s2071_s15, %s2067_s13  ;;  %p2075_p6 = scmp.lt.u32.totalorder %s2067_s13, %s2614_s21 }
 0xbc0   : > { %p2069_p2 = pnand %p2068_p12, %p2385_p5 }
 0xbc1   : > { %p2074_p8 = por %p2073_p10, %p2072_p1 }
 0xbc2   : > { %p2070_p11 = pneg %p2069_p2 }
 0xbc3   : > { %p2076_p0 = por %p2075_p6, %p2074_p8 }
 0xbc5   : > { %p2077_p3 = pnand %p2076_p0, %p2070_p11 }
 0xbc7   : > { %2080 = shalt.err (!%p2077_p3)
}
 0xbc8   : > { %s2160_s30 = smov 128   ;;  %s2161_s16 = smov 8   ;;  %v1348_v22 = vpop.permute.xlu1 %1347 }
 0xbc9   : > { %1779 = dma.vmem_to_hbm [thread:$0]  (%p2385_p5), %s2616_s20, 384, %s2614_s21, %s1352_s10, %s2160_s30, %s2160_s30, %s2161_s16   ;;  %1350 = vst.msk [vmem:[#allocation6] sm:$0xff] %vm515_vm3, %v1348_v22 }
 0xbca PF: > { %s2702_s24 = sld [smem:[#allocation21_spill]]  ;;  %s2703_s9 = sld [smem:[#allocation22_spill]] }
 0xbcb   : > { %p1811_p7 = scmp.ge.s32.totalorder %s2143_s29, 2 }
 0xbd0   : > { %s1381_s27 = sand.u32 1, %s2702_s24   ;;  %p2704_p9 = scmp.ne.s32.totalorder %s2703_s9, 0 }
 0xbd1   : > { %s1382_s11 = scalar_lea.sflag [#allocation9], %s1381_s27 }
 0xbd2   : > { %p1799_p13 = pnand %p1811_p7, %p2704_p9 }
 0xbd4   : > { %2118 = dma.done.wait (!%p1799_p13), %s1382_s11, 384  }
 0xbd5   : > { %2120 = vsyncadd (!%p1799_p13), %s1382_s11, 4294966912  ;;  %s25_s29 = sadd.s32 1, %s2143_s29   ;;  %s2705_s24 = smov %s2127_s25 }
 0xbd6   : > { %p22_p4 = scmp.ge.s32.totalorder %s25_s29, 5   ;;  %s2706_s25 = smov %s2131_s26 }
 0xbd7   : > { %s2707_s26 = smov %s2397_s17  ;;  %s2708_s27 = smov %s2139_s28 }
 0xbd8   : > { %s2709_s28 = smov %s2711_s14  ;;  %24 = sbr.rel (!%p22_p4) target bundleno = 11 (0xb), region = 117 }
 0xbdf   :  { %1387 = vsyncpa [#allocation8], 1 }
 0xbe0   :  { %1389 = vsyncpa [#allocation8 + $0x1], 1 }
 0xbe1   :  { %1390 = vsyncpa [#allocation11], 1 }
 0xbe2   :  { %1391 = vsyncpa [#allocation14], 1 }
 0xbe3   :  { %1392 = vsyncpa [#allocation9], 1 }
 0xbe4   :  { %1394 = vsyncpa [#allocation9 + $0x1], 1 }

</bundles_post_ra>
